<compile_context>
chip_gen: v7x
topology: tpu7x:2x2x1
jax: 0.10.0
libtpu: 0.0.40
codegen_flags: <defaults>
</compile_context>

<pallas_src>
import functools

import jax
import jax.numpy as jnp
from jax import lax
from jax.experimental import pallas as pl
from jax.experimental.pallas import tpu as pltpu

# ---------------- configuration (SABlock __init__ args) ----------------
HIDDEN_SIZE = 32          # hidden_size == hidden_input_size
NUM_HEADS = 4
DIM_HEAD = HIDDEN_SIZE // NUM_HEADS      # dim_head defaults to hidden//heads
INNER_DIM = NUM_HEADS * DIM_HEAD

BATCH = 2
SEQ = 16

LANE = 128                # TPU lane width; output channels padded to this


def _sablock_kernel(x_ref, wq_ref, wk_ref, wv_ref, wo_ref, bo_ref, o_ref, *,
                    batch, seq, num_heads, dim_head, scale):
    """Entire (B, N, C) problem in one grid step.

    x_ref          : (B*N, C)      flattened tokens
    wq/wk/wv_ref   : (H, C, D)     per-head pre-transposed projection weights
    wo_ref         : (H, D, C_pad) per-head pre-transposed out-proj weight
    bo_ref         : (1, C_pad)    out-proj bias (lane-padded)
    o_ref          : (B*N, C_pad)  lane-dense output slab
    """
    del num_heads  # implied by the weight refs' leading dim
    x = x_ref[...]                                   # (B*N, C) f32
    bn = batch * seq
    c_pad = o_ref.shape[-1]

    # contract the last dim of both operands: q @ k^T without explicit .T
    qk_dims = (((1,), (1,)), ((), ()))

    y = jnp.zeros((bn, c_pad), dtype=jnp.float32)
    for h in range(wq_ref.shape[0]):                 # static unroll, H=4
        # Flattened per-head projections (qkv_bias=False). Weights are already
        # (C, D) per head, so no in-kernel transpose and no 8-lane slicing.
        q = jnp.dot(x, wq_ref[h], preferred_element_type=jnp.float32) * scale
        k = jnp.dot(x, wk_ref[h], preferred_element_type=jnp.float32)
        v = jnp.dot(x, wv_ref[h], preferred_element_type=jnp.float32)

        ctx_rows = []
        for b in range(batch):                       # static unroll, B=2
            r0 = b * seq
            q_b = q[r0:r0 + seq, :]                  # (N, D) sublane views
            k_b = k[r0:r0 + seq, :]
            v_b = v[r0:r0 + seq, :]

            s = lax.dot_general(q_b, k_b, qk_dims,
                                preferred_element_type=jnp.float32)  # (N, N)
            s = s - jnp.max(s, axis=-1, keepdims=True)
            p = jnp.exp(s)
            p = p * pl.reciprocal(jnp.sum(p, axis=-1, keepdims=True),
                                  approx=True)
            ctx_rows.append(
                jnp.dot(p, v_b, preferred_element_type=jnp.float32))  # (N, D)

        # stack the two batches back to (B*N, D) (sublane-direction concat)
        ctx = jnp.concatenate(ctx_rows, axis=0)
        # fold the head-concat into the out-projection: accumulate per head
        y = y + jnp.dot(ctx, wo_ref[h], preferred_element_type=jnp.float32)

    o_ref[...] = (y + bo_ref[...]).astype(o_ref.dtype)


def sablock_forward(x, w_qkv, w_out, b_out,
                    *, num_heads=NUM_HEADS, dim_head=DIM_HEAD):
    """x: (B, N, C) float32 -> (B, N, C) float32."""
    b, n, c = x.shape
    h, d = num_heads, dim_head
    inner = h * d
    c_out = w_out.shape[0]
    c_pad = ((c_out + LANE - 1) // LANE) * LANE      # lane-dense output width

    # ---- weight/layout plumbing done once, outside the kernel (free) ----
    # Combined qkv weight rows are ordered (qkv, head, dim), matching
    # Rearrange('b h (qkv l d) -> qkv b l h d'). Pre-transpose + split per head.
    def per_head(w):                                 # (inner, C) -> (H, C, D)
        return jnp.transpose(w.reshape(h, d, c), (0, 2, 1))

    wq3 = per_head(w_qkv[0 * inner:1 * inner])
    wk3 = per_head(w_qkv[1 * inner:2 * inner])
    wv3 = per_head(w_qkv[2 * inner:3 * inner])

    wo3 = jnp.transpose(w_out, (1, 0)).reshape(h, d, c_out)    # (H, D, C_out)
    wo3 = jnp.pad(wo3, ((0, 0), (0, 0), (0, c_pad - c_out)))   # lane-dense pad
    bo = jnp.pad(b_out, (0, c_pad - c_out)).reshape(1, c_pad)

    x2 = x.reshape(b * n, c)

    kernel = functools.partial(
        _sablock_kernel, batch=b, seq=n, num_heads=h, dim_head=d,
        scale=d ** (-0.5))

    # NOTE(v7x): if B (or B*H) grows, reintroduce a leading "parallel" grid
    # axis so both TensorCores get work; at B=2 the collapsed grid wins.
    out = pl.pallas_call(
        kernel,
        out_shape=jax.ShapeDtypeStruct((b * n, c_pad), x.dtype),
        grid_spec=pltpu.PrefetchScalarGridSpec(
            num_scalar_prefetch=0,
            grid=(1,),
            in_specs=[
                pl.BlockSpec((b * n, c), lambda i: (0, 0)),        # x
                pl.BlockSpec((h, c, d), lambda i: (0, 0, 0)),      # W_q per head
                pl.BlockSpec((h, c, d), lambda i: (0, 0, 0)),      # W_k per head
                pl.BlockSpec((h, c, d), lambda i: (0, 0, 0)),      # W_v per head
                pl.BlockSpec((h, d, c_pad), lambda i: (0, 0, 0)),  # W_out per head
                pl.BlockSpec((1, c_pad), lambda i: (0, 0)),        # b_out
            ],
            out_specs=pl.BlockSpec((b * n, c_pad), lambda i: (0, 0)),
        ),
        compiler_params=pltpu.CompilerParams(
            dimension_semantics=("arbitrary",)),
    )(x2, wq3, wk3, wv3, wo3, bo)

    return out[:, :c_out].reshape(b, n, c_out)


def sablock_reference(x, w_qkv, w_out, b_out,
                      *, num_heads=NUM_HEADS, dim_head=DIM_HEAD):
    """Pure-JAX reference matching the PyTorch SABlock forward."""
    b, n, c = x.shape
    inner = num_heads * dim_head
    qkv = jnp.einsum('bnc,oc->bno', x, w_qkv)                    # (B, N, 3*inner)
    qkv = qkv.reshape(b, n, 3, num_heads, dim_head)
    qkv = jnp.transpose(qkv, (2, 0, 3, 1, 4))                    # (3, B, H, N, D)
    q, k, v = qkv[0], qkv[1], qkv[2]
    att = jnp.einsum('bhxd,bhyd->bhxy', q, k) * (dim_head ** -0.5)
    att = jax.nn.softmax(att, axis=-1)
    ctx = jnp.einsum('bhxy,bhyd->bhxd', att, v)                  # (B, H, N, D)
    ctx = jnp.transpose(ctx, (0, 2, 1, 3)).reshape(b, n, inner)  # b l h d -> b h (l d)
    return jnp.einsum('bni,oi->bno', ctx, w_out) + b_out


if __name__ == "__main__":
    key = jax.random.PRNGKey(0)
    k_x, k_qkv, k_wo, k_bo = jax.random.split(key, 4)

    x = jax.random.normal(k_x, (BATCH, SEQ, HIDDEN_SIZE), dtype=jnp.float32)

    # nn.Linear weight layout: (out_features, in_features).
    w_qkv = 0.05 * jax.random.normal(
        k_qkv, (3 * INNER_DIM, HIDDEN_SIZE), dtype=jnp.float32)
    w_out = 0.05 * jax.random.normal(
        k_wo, (HIDDEN_SIZE, INNER_DIM), dtype=jnp.float32)
    b_out = 0.05 * jax.random.normal(k_bo, (HIDDEN_SIZE,), dtype=jnp.float32)

    out = jax.jit(sablock_forward)(x, w_qkv, w_out, b_out)
    out = jax.block_until_ready(out)

    ref = jax.block_until_ready(sablock_reference(x, w_qkv, w_out, b_out))
    assert out.shape == (BATCH, SEQ, HIDDEN_SIZE)
    # tolerance loosened slightly vs 1e-4 because of pl.reciprocal(approx=True)
    assert jnp.allclose(out, ref, atol=2e-3, rtol=2e-3), "mismatch vs reference"

    print("KERNEL_OK")
</pallas_src>

<mosaic_0001>
module attributes {stable_mosaic.version = 11 : i64} {
  func.func @_sablock_kernel(%arg0: i32, %arg1: memref<32x32xf32, #tpu.memory_space<vmem>>, %arg2: memref<4x32x8xf32, #tpu.memory_space<vmem>>, %arg3: memref<4x32x8xf32, #tpu.memory_space<vmem>>, %arg4: memref<4x32x8xf32, #tpu.memory_space<vmem>>, %arg5: memref<4x8x128xf32, #tpu.memory_space<vmem>>, %arg6: memref<1x128xf32, #tpu.memory_space<vmem>>, %arg7: memref<32x128xf32, #tpu.memory_space<vmem>>) attributes {dimension_semantics = [#tpu.dimension_semantics<arbitrary>], iteration_bounds = array<i64: 1>, scalar_prefetch = 0 : i64, scratch_operands = 0 : i64, tpu.core_type = #tpu.core_type<tc>, window_params = [{pipeline_mode = #tpu.pipeline_mode<synchronous>, transform_indices = @transform_0, window_bounds = array<i64: 32, 32>}, {pipeline_mode = #tpu.pipeline_mode<synchronous>, transform_indices = @transform_1, window_bounds = array<i64: 4, 32, 8>}, {pipeline_mode = #tpu.pipeline_mode<synchronous>, transform_indices = @transform_2, window_bounds = array<i64: 4, 32, 8>}, {pipeline_mode = #tpu.pipeline_mode<synchronous>, transform_indices = @transform_3, window_bounds = array<i64: 4, 32, 8>}, {pipeline_mode = #tpu.pipeline_mode<synchronous>, transform_indices = @transform_4, window_bounds = array<i64: 4, 8, 128>}, {pipeline_mode = #tpu.pipeline_mode<synchronous>, transform_indices = @transform_5, window_bounds = array<i64: 1, 128>}, {pipeline_mode = #tpu.pipeline_mode<synchronous>, transform_indices = @transform_6, window_bounds = array<i64: 32, 128>}]} {
    %c0 = arith.constant 0 : index
    %c0_0 = arith.constant 0 : index
    %0 = vector.load %arg1[%c0, %c0_0] : memref<32x32xf32, #tpu.memory_space<vmem>>, vector<32x32xf32>
    %cst = arith.constant 0.000000e+00 : f32
    %1 = vector.broadcast %cst : f32 to vector<32x128xf32>
    %c0_1 = arith.constant 0 : index
    %c0_2 = arith.constant 0 : index
    %c0_3 = arith.constant 0 : index
    %2 = vector.load %arg2[%c0_1, %c0_2, %c0_3] : memref<4x32x8xf32, #tpu.memory_space<vmem>>, vector<1x32x8xf32>
    %3 = vector.shape_cast %2 : vector<1x32x8xf32> to vector<32x8xf32>
    %cst_4 = arith.constant dense<0.000000e+00> : vector<32x8xf32>
    %4 = tpu.matmul %0, %3, %cst_4 {dimension_numbers = #tpu.dot_dimension_numbers<[1], [0], [0], [1], [0, 0, 1, 1], [], []>} : vector<32x32xf32>, vector<32x8xf32>, vector<32x8xf32> -> vector<32x8xf32>
    %cst_5 = arith.constant 0.353553385 : f32
    %5 = vector.broadcast %cst_5 : f32 to vector<32x8xf32>
    %6 = arith.mulf %4, %5 : vector<32x8xf32>
    %c0_6 = arith.constant 0 : index
    %c0_7 = arith.constant 0 : index
    %c0_8 = arith.constant 0 : index
    %7 = vector.load %arg3[%c0_6, %c0_7, %c0_8] : memref<4x32x8xf32, #tpu.memory_space<vmem>>, vector<1x32x8xf32>
    %8 = vector.shape_cast %7 : vector<1x32x8xf32> to vector<32x8xf32>
    %cst_9 = arith.constant dense<0.000000e+00> : vector<32x8xf32>
    %9 = tpu.matmul %0, %8, %cst_9 {dimension_numbers = #tpu.dot_dimension_numbers<[1], [0], [0], [1], [0, 0, 1, 1], [], []>} : vector<32x32xf32>, vector<32x8xf32>, vector<32x8xf32> -> vector<32x8xf32>
    %c0_10 = arith.constant 0 : index
    %c0_11 = arith.constant 0 : index
    %c0_12 = arith.constant 0 : index
    %10 = vector.load %arg4[%c0_10, %c0_11, %c0_12] : memref<4x32x8xf32, #tpu.memory_space<vmem>>, vector<1x32x8xf32>
    %11 = vector.shape_cast %10 : vector<1x32x8xf32> to vector<32x8xf32>
    %cst_13 = arith.constant dense<0.000000e+00> : vector<32x8xf32>
    %12 = tpu.matmul %0, %11, %cst_13 {dimension_numbers = #tpu.dot_dimension_numbers<[1], [0], [0], [1], [0, 0, 1, 1], [], []>} : vector<32x32xf32>, vector<32x8xf32>, vector<32x8xf32> -> vector<32x8xf32>
    %13 = vector.extract_strided_slice %6 {offsets = [0, 0], sizes = [16, 8], strides = [1, 1]} : vector<32x8xf32> to vector<16x8xf32>
    %14 = vector.extract_strided_slice %9 {offsets = [0, 0], sizes = [16, 8], strides = [1, 1]} : vector<32x8xf32> to vector<16x8xf32>
    %15 = vector.extract_strided_slice %12 {offsets = [0, 0], sizes = [16, 8], strides = [1, 1]} : vector<32x8xf32> to vector<16x8xf32>
    %cst_14 = arith.constant dense<0.000000e+00> : vector<16x16xf32>
    %16 = tpu.matmul %13, %14, %cst_14 {dimension_numbers = #tpu.dot_dimension_numbers<[1], [1], [0], [0], [0, 0, 1, 0], [], []>} : vector<16x8xf32>, vector<16x8xf32>, vector<16x16xf32> -> vector<16x16xf32>
    %cst_15 = arith.constant dense<0xFF800000> : vector<16xf32>
    %17 = vector.multi_reduction <maximumf>, %16, %cst_15 [1] : vector<16x16xf32> to vector<16xf32>
    %18 = vector.shape_cast %17 : vector<16xf32> to vector<16x1xf32>
    %19 = vector.broadcast %18 : vector<16x1xf32> to vector<16x16xf32>
    %20 = arith.subf %16, %19 : vector<16x16xf32>
    %21 = math.exp %20 : vector<16x16xf32>
    %cst_16 = arith.constant dense<0.000000e+00> : vector<16xf32>
    %22 = vector.multi_reduction <add>, %21, %cst_16 [1] : vector<16x16xf32> to vector<16xf32>
    %23 = vector.shape_cast %22 : vector<16xf32> to vector<16x1xf32>
    %24 = tpu.reciprocal %23 {approx = true} : vector<16x1xf32> -> vector<16x1xf32>
    %25 = vector.broadcast %24 : vector<16x1xf32> to vector<16x16xf32>
    %26 = arith.mulf %21, %25 : vector<16x16xf32>
    %cst_17 = arith.constant dense<0.000000e+00> : vector<16x8xf32>
    %27 = tpu.matmul %26, %15, %cst_17 {dimension_numbers = #tpu.dot_dimension_numbers<[1], [0], [0], [1], [0, 0, 1, 1], [], []>} : vector<16x16xf32>, vector<16x8xf32>, vector<16x8xf32> -> vector<16x8xf32>
    %28 = vector.extract_strided_slice %6 {offsets = [16, 0], sizes = [16, 8], strides = [1, 1]} : vector<32x8xf32> to vector<16x8xf32>
    %29 = vector.extract_strided_slice %9 {offsets = [16, 0], sizes = [16, 8], strides = [1, 1]} : vector<32x8xf32> to vector<16x8xf32>
    %30 = vector.extract_strided_slice %12 {offsets = [16, 0], sizes = [16, 8], strides = [1, 1]} : vector<32x8xf32> to vector<16x8xf32>
    %cst_18 = arith.constant dense<0.000000e+00> : vector<16x16xf32>
    %31 = tpu.matmul %28, %29, %cst_18 {dimension_numbers = #tpu.dot_dimension_numbers<[1], [1], [0], [0], [0, 0, 1, 0], [], []>} : vector<16x8xf32>, vector<16x8xf32>, vector<16x16xf32> -> vector<16x16xf32>
    %cst_19 = arith.constant dense<0xFF800000> : vector<16xf32>
    %32 = vector.multi_reduction <maximumf>, %31, %cst_19 [1] : vector<16x16xf32> to vector<16xf32>
    %33 = vector.shape_cast %32 : vector<16xf32> to vector<16x1xf32>
    %34 = vector.broadcast %33 : vector<16x1xf32> to vector<16x16xf32>
    %35 = arith.subf %31, %34 : vector<16x16xf32>
    %36 = math.exp %35 : vector<16x16xf32>
    %cst_20 = arith.constant dense<0.000000e+00> : vector<16xf32>
    %37 = vector.multi_reduction <add>, %36, %cst_20 [1] : vector<16x16xf32> to vector<16xf32>
    %38 = vector.shape_cast %37 : vector<16xf32> to vector<16x1xf32>
    %39 = tpu.reciprocal %38 {approx = true} : vector<16x1xf32> -> vector<16x1xf32>
    %40 = vector.broadcast %39 : vector<16x1xf32> to vector<16x16xf32>
    %41 = arith.mulf %36, %40 : vector<16x16xf32>
    %cst_21 = arith.constant dense<0.000000e+00> : vector<16x8xf32>
    %42 = tpu.matmul %41, %30, %cst_21 {dimension_numbers = #tpu.dot_dimension_numbers<[1], [0], [0], [1], [0, 0, 1, 1], [], []>} : vector<16x16xf32>, vector<16x8xf32>, vector<16x8xf32> -> vector<16x8xf32>
    %43 = tpu.concatenate %27, %42 in 0 : vector<16x8xf32>, vector<16x8xf32> -> vector<32x8xf32>
    %c0_22 = arith.constant 0 : index
    %c0_23 = arith.constant 0 : index
    %c0_24 = arith.constant 0 : index
    %44 = vector.load %arg5[%c0_22, %c0_23, %c0_24] : memref<4x8x128xf32, #tpu.memory_space<vmem>>, vector<1x8x128xf32>
    %45 = vector.shape_cast %44 : vector<1x8x128xf32> to vector<8x128xf32>
    %cst_25 = arith.constant dense<0.000000e+00> : vector<32x128xf32>
    %46 = tpu.matmul %43, %45, %cst_25 {dimension_numbers = #tpu.dot_dimension_numbers<[1], [0], [0], [1], [0, 0, 1, 1], [], []>} : vector<32x8xf32>, vector<8x128xf32>, vector<32x128xf32> -> vector<32x128xf32>
    %47 = arith.addf %1, %46 : vector<32x128xf32>
    %c1 = arith.constant 1 : index
    %c0_26 = arith.constant 0 : index
    %c0_27 = arith.constant 0 : index
    %48 = vector.load %arg2[%c1, %c0_26, %c0_27] : memref<4x32x8xf32, #tpu.memory_space<vmem>>, vector<1x32x8xf32>
    %49 = vector.shape_cast %48 : vector<1x32x8xf32> to vector<32x8xf32>
    %cst_28 = arith.constant dense<0.000000e+00> : vector<32x8xf32>
    %50 = tpu.matmul %0, %49, %cst_28 {dimension_numbers = #tpu.dot_dimension_numbers<[1], [0], [0], [1], [0, 0, 1, 1], [], []>} : vector<32x32xf32>, vector<32x8xf32>, vector<32x8xf32> -> vector<32x8xf32>
    %cst_29 = arith.constant 0.353553385 : f32
    %51 = vector.broadcast %cst_29 : f32 to vector<32x8xf32>
    %52 = arith.mulf %50, %51 : vector<32x8xf32>
    %c1_30 = arith.constant 1 : index
    %c0_31 = arith.constant 0 : index
    %c0_32 = arith.constant 0 : index
    %53 = vector.load %arg3[%c1_30, %c0_31, %c0_32] : memref<4x32x8xf32, #tpu.memory_space<vmem>>, vector<1x32x8xf32>
    %54 = vector.shape_cast %53 : vector<1x32x8xf32> to vector<32x8xf32>
    %cst_33 = arith.constant dense<0.000000e+00> : vector<32x8xf32>
    %55 = tpu.matmul %0, %54, %cst_33 {dimension_numbers = #tpu.dot_dimension_numbers<[1], [0], [0], [1], [0, 0, 1, 1], [], []>} : vector<32x32xf32>, vector<32x8xf32>, vector<32x8xf32> -> vector<32x8xf32>
    %c1_34 = arith.constant 1 : index
    %c0_35 = arith.constant 0 : index
    %c0_36 = arith.constant 0 : index
    %56 = vector.load %arg4[%c1_34, %c0_35, %c0_36] : memref<4x32x8xf32, #tpu.memory_space<vmem>>, vector<1x32x8xf32>
    %57 = vector.shape_cast %56 : vector<1x32x8xf32> to vector<32x8xf32>
    %cst_37 = arith.constant dense<0.000000e+00> : vector<32x8xf32>
    %58 = tpu.matmul %0, %57, %cst_37 {dimension_numbers = #tpu.dot_dimension_numbers<[1], [0], [0], [1], [0, 0, 1, 1], [], []>} : vector<32x32xf32>, vector<32x8xf32>, vector<32x8xf32> -> vector<32x8xf32>
    %59 = vector.extract_strided_slice %52 {offsets = [0, 0], sizes = [16, 8], strides = [1, 1]} : vector<32x8xf32> to vector<16x8xf32>
    %60 = vector.extract_strided_slice %55 {offsets = [0, 0], sizes = [16, 8], strides = [1, 1]} : vector<32x8xf32> to vector<16x8xf32>
    %61 = vector.extract_strided_slice %58 {offsets = [0, 0], sizes = [16, 8], strides = [1, 1]} : vector<32x8xf32> to vector<16x8xf32>
    %cst_38 = arith.constant dense<0.000000e+00> : vector<16x16xf32>
    %62 = tpu.matmul %59, %60, %cst_38 {dimension_numbers = #tpu.dot_dimension_numbers<[1], [1], [0], [0], [0, 0, 1, 0], [], []>} : vector<16x8xf32>, vector<16x8xf32>, vector<16x16xf32> -> vector<16x16xf32>
    %cst_39 = arith.constant dense<0xFF800000> : vector<16xf32>
    %63 = vector.multi_reduction <maximumf>, %62, %cst_39 [1] : vector<16x16xf32> to vector<16xf32>
    %64 = vector.shape_cast %63 : vector<16xf32> to vector<16x1xf32>
    %65 = vector.broadcast %64 : vector<16x1xf32> to vector<16x16xf32>
    %66 = arith.subf %62, %65 : vector<16x16xf32>
    %67 = math.exp %66 : vector<16x16xf32>
    %cst_40 = arith.constant dense<0.000000e+00> : vector<16xf32>
    %68 = vector.multi_reduction <add>, %67, %cst_40 [1] : vector<16x16xf32> to vector<16xf32>
    %69 = vector.shape_cast %68 : vector<16xf32> to vector<16x1xf32>
    %70 = tpu.reciprocal %69 {approx = true} : vector<16x1xf32> -> vector<16x1xf32>
    %71 = vector.broadcast %70 : vector<16x1xf32> to vector<16x16xf32>
    %72 = arith.mulf %67, %71 : vector<16x16xf32>
    %cst_41 = arith.constant dense<0.000000e+00> : vector<16x8xf32>
    %73 = tpu.matmul %72, %61, %cst_41 {dimension_numbers = #tpu.dot_dimension_numbers<[1], [0], [0], [1], [0, 0, 1, 1], [], []>} : vector<16x16xf32>, vector<16x8xf32>, vector<16x8xf32> -> vector<16x8xf32>
    %74 = vector.extract_strided_slice %52 {offsets = [16, 0], sizes = [16, 8], strides = [1, 1]} : vector<32x8xf32> to vector<16x8xf32>
    %75 = vector.extract_strided_slice %55 {offsets = [16, 0], sizes = [16, 8], strides = [1, 1]} : vector<32x8xf32> to vector<16x8xf32>
    %76 = vector.extract_strided_slice %58 {offsets = [16, 0], sizes = [16, 8], strides = [1, 1]} : vector<32x8xf32> to vector<16x8xf32>
    %cst_42 = arith.constant dense<0.000000e+00> : vector<16x16xf32>
    %77 = tpu.matmul %74, %75, %cst_42 {dimension_numbers = #tpu.dot_dimension_numbers<[1], [1], [0], [0], [0, 0, 1, 0], [], []>} : vector<16x8xf32>, vector<16x8xf32>, vector<16x16xf32> -> vector<16x16xf32>
    %cst_43 = arith.constant dense<0xFF800000> : vector<16xf32>
    %78 = vector.multi_reduction <maximumf>, %77, %cst_43 [1] : vector<16x16xf32> to vector<16xf32>
    %79 = vector.shape_cast %78 : vector<16xf32> to vector<16x1xf32>
    %80 = vector.broadcast %79 : vector<16x1xf32> to vector<16x16xf32>
    %81 = arith.subf %77, %80 : vector<16x16xf32>
    %82 = math.exp %81 : vector<16x16xf32>
    %cst_44 = arith.constant dense<0.000000e+00> : vector<16xf32>
    %83 = vector.multi_reduction <add>, %82, %cst_44 [1] : vector<16x16xf32> to vector<16xf32>
    %84 = vector.shape_cast %83 : vector<16xf32> to vector<16x1xf32>
    %85 = tpu.reciprocal %84 {approx = true} : vector<16x1xf32> -> vector<16x1xf32>
    %86 = vector.broadcast %85 : vector<16x1xf32> to vector<16x16xf32>
    %87 = arith.mulf %82, %86 : vector<16x16xf32>
    %cst_45 = arith.constant dense<0.000000e+00> : vector<16x8xf32>
    %88 = tpu.matmul %87, %76, %cst_45 {dimension_numbers = #tpu.dot_dimension_numbers<[1], [0], [0], [1], [0, 0, 1, 1], [], []>} : vector<16x16xf32>, vector<16x8xf32>, vector<16x8xf32> -> vector<16x8xf32>
    %89 = tpu.concatenate %73, %88 in 0 : vector<16x8xf32>, vector<16x8xf32> -> vector<32x8xf32>
    %c1_46 = arith.constant 1 : index
    %c0_47 = arith.constant 0 : index
    %c0_48 = arith.constant 0 : index
    %90 = vector.load %arg5[%c1_46, %c0_47, %c0_48] : memref<4x8x128xf32, #tpu.memory_space<vmem>>, vector<1x8x128xf32>
    %91 = vector.shape_cast %90 : vector<1x8x128xf32> to vector<8x128xf32>
    %cst_49 = arith.constant dense<0.000000e+00> : vector<32x128xf32>
    %92 = tpu.matmul %89, %91, %cst_49 {dimension_numbers = #tpu.dot_dimension_numbers<[1], [0], [0], [1], [0, 0, 1, 1], [], []>} : vector<32x8xf32>, vector<8x128xf32>, vector<32x128xf32> -> vector<32x128xf32>
    %93 = arith.addf %47, %92 : vector<32x128xf32>
    %c2 = arith.constant 2 : index
    %c0_50 = arith.constant 0 : index
    %c0_51 = arith.constant 0 : index
    %94 = vector.load %arg2[%c2, %c0_50, %c0_51] : memref<4x32x8xf32, #tpu.memory_space<vmem>>, vector<1x32x8xf32>
    %95 = vector.shape_cast %94 : vector<1x32x8xf32> to vector<32x8xf32>
    %cst_52 = arith.constant dense<0.000000e+00> : vector<32x8xf32>
    %96 = tpu.matmul %0, %95, %cst_52 {dimension_numbers = #tpu.dot_dimension_numbers<[1], [0], [0], [1], [0, 0, 1, 1], [], []>} : vector<32x32xf32>, vector<32x8xf32>, vector<32x8xf32> -> vector<32x8xf32>
    %cst_53 = arith.constant 0.353553385 : f32
    %97 = vector.broadcast %cst_53 : f32 to vector<32x8xf32>
    %98 = arith.mulf %96, %97 : vector<32x8xf32>
    %c2_54 = arith.constant 2 : index
    %c0_55 = arith.constant 0 : index
    %c0_56 = arith.constant 0 : index
    %99 = vector.load %arg3[%c2_54, %c0_55, %c0_56] : memref<4x32x8xf32, #tpu.memory_space<vmem>>, vector<1x32x8xf32>
    %100 = vector.shape_cast %99 : vector<1x32x8xf32> to vector<32x8xf32>
    %cst_57 = arith.constant dense<0.000000e+00> : vector<32x8xf32>
    %101 = tpu.matmul %0, %100, %cst_57 {dimension_numbers = #tpu.dot_dimension_numbers<[1], [0], [0], [1], [0, 0, 1, 1], [], []>} : vector<32x32xf32>, vector<32x8xf32>, vector<32x8xf32> -> vector<32x8xf32>
    %c2_58 = arith.constant 2 : index
    %c0_59 = arith.constant 0 : index
    %c0_60 = arith.constant 0 : index
    %102 = vector.load %arg4[%c2_58, %c0_59, %c0_60] : memref<4x32x8xf32, #tpu.memory_space<vmem>>, vector<1x32x8xf32>
    %103 = vector.shape_cast %102 : vector<1x32x8xf32> to vector<32x8xf32>
    %cst_61 = arith.constant dense<0.000000e+00> : vector<32x8xf32>
    %104 = tpu.matmul %0, %103, %cst_61 {dimension_numbers = #tpu.dot_dimension_numbers<[1], [0], [0], [1], [0, 0, 1, 1], [], []>} : vector<32x32xf32>, vector<32x8xf32>, vector<32x8xf32> -> vector<32x8xf32>
    %105 = vector.extract_strided_slice %98 {offsets = [0, 0], sizes = [16, 8], strides = [1, 1]} : vector<32x8xf32> to vector<16x8xf32>
    %106 = vector.extract_strided_slice %101 {offsets = [0, 0], sizes = [16, 8], strides = [1, 1]} : vector<32x8xf32> to vector<16x8xf32>
    %107 = vector.extract_strided_slice %104 {offsets = [0, 0], sizes = [16, 8], strides = [1, 1]} : vector<32x8xf32> to vector<16x8xf32>
    %cst_62 = arith.constant dense<0.000000e+00> : vector<16x16xf32>
    %108 = tpu.matmul %105, %106, %cst_62 {dimension_numbers = #tpu.dot_dimension_numbers<[1], [1], [0], [0], [0, 0, 1, 0], [], []>} : vector<16x8xf32>, vector<16x8xf32>, vector<16x16xf32> -> vector<16x16xf32>
    %cst_63 = arith.constant dense<0xFF800000> : vector<16xf32>
    %109 = vector.multi_reduction <maximumf>, %108, %cst_63 [1] : vector<16x16xf32> to vector<16xf32>
    %110 = vector.shape_cast %109 : vector<16xf32> to vector<16x1xf32>
    %111 = vector.broadcast %110 : vector<16x1xf32> to vector<16x16xf32>
    %112 = arith.subf %108, %111 : vector<16x16xf32>
    %113 = math.exp %112 : vector<16x16xf32>
    %cst_64 = arith.constant dense<0.000000e+00> : vector<16xf32>
    %114 = vector.multi_reduction <add>, %113, %cst_64 [1] : vector<16x16xf32> to vector<16xf32>
    %115 = vector.shape_cast %114 : vector<16xf32> to vector<16x1xf32>
    %116 = tpu.reciprocal %115 {approx = true} : vector<16x1xf32> -> vector<16x1xf32>
    %117 = vector.broadcast %116 : vector<16x1xf32> to vector<16x16xf32>
    %118 = arith.mulf %113, %117 : vector<16x16xf32>
    %cst_65 = arith.constant dense<0.000000e+00> : vector<16x8xf32>
    %119 = tpu.matmul %118, %107, %cst_65 {dimension_numbers = #tpu.dot_dimension_numbers<[1], [0], [0], [1], [0, 0, 1, 1], [], []>} : vector<16x16xf32>, vector<16x8xf32>, vector<16x8xf32> -> vector<16x8xf32>
    %120 = vector.extract_strided_slice %98 {offsets = [16, 0], sizes = [16, 8], strides = [1, 1]} : vector<32x8xf32> to vector<16x8xf32>
    %121 = vector.extract_strided_slice %101 {offsets = [16, 0], sizes = [16, 8], strides = [1, 1]} : vector<32x8xf32> to vector<16x8xf32>
    %122 = vector.extract_strided_slice %104 {offsets = [16, 0], sizes = [16, 8], strides = [1, 1]} : vector<32x8xf32> to vector<16x8xf32>
    %cst_66 = arith.constant dense<0.000000e+00> : vector<16x16xf32>
    %123 = tpu.matmul %120, %121, %cst_66 {dimension_numbers = #tpu.dot_dimension_numbers<[1], [1], [0], [0], [0, 0, 1, 0], [], []>} : vector<16x8xf32>, vector<16x8xf32>, vector<16x16xf32> -> vector<16x16xf32>
    %cst_67 = arith.constant dense<0xFF800000> : vector<16xf32>
    %124 = vector.multi_reduction <maximumf>, %123, %cst_67 [1] : vector<16x16xf32> to vector<16xf32>
    %125 = vector.shape_cast %124 : vector<16xf32> to vector<16x1xf32>
    %126 = vector.broadcast %125 : vector<16x1xf32> to vector<16x16xf32>
    %127 = arith.subf %123, %126 : vector<16x16xf32>
    %128 = math.exp %127 : vector<16x16xf32>
    %cst_68 = arith.constant dense<0.000000e+00> : vector<16xf32>
    %129 = vector.multi_reduction <add>, %128, %cst_68 [1] : vector<16x16xf32> to vector<16xf32>
    %130 = vector.shape_cast %129 : vector<16xf32> to vector<16x1xf32>
    %131 = tpu.reciprocal %130 {approx = true} : vector<16x1xf32> -> vector<16x1xf32>
    %132 = vector.broadcast %131 : vector<16x1xf32> to vector<16x16xf32>
    %133 = arith.mulf %128, %132 : vector<16x16xf32>
    %cst_69 = arith.constant dense<0.000000e+00> : vector<16x8xf32>
    %134 = tpu.matmul %133, %122, %cst_69 {dimension_numbers = #tpu.dot_dimension_numbers<[1], [0], [0], [1], [0, 0, 1, 1], [], []>} : vector<16x16xf32>, vector<16x8xf32>, vector<16x8xf32> -> vector<16x8xf32>
    %135 = tpu.concatenate %119, %134 in 0 : vector<16x8xf32>, vector<16x8xf32> -> vector<32x8xf32>
    %c2_70 = arith.constant 2 : index
    %c0_71 = arith.constant 0 : index
    %c0_72 = arith.constant 0 : index
    %136 = vector.load %arg5[%c2_70, %c0_71, %c0_72] : memref<4x8x128xf32, #tpu.memory_space<vmem>>, vector<1x8x128xf32>
    %137 = vector.shape_cast %136 : vector<1x8x128xf32> to vector<8x128xf32>
    %cst_73 = arith.constant dense<0.000000e+00> : vector<32x128xf32>
    %138 = tpu.matmul %135, %137, %cst_73 {dimension_numbers = #tpu.dot_dimension_numbers<[1], [0], [0], [1], [0, 0, 1, 1], [], []>} : vector<32x8xf32>, vector<8x128xf32>, vector<32x128xf32> -> vector<32x128xf32>
    %139 = arith.addf %93, %138 : vector<32x128xf32>
    %c3 = arith.constant 3 : index
    %c0_74 = arith.constant 0 : index
    %c0_75 = arith.constant 0 : index
    %140 = vector.load %arg2[%c3, %c0_74, %c0_75] : memref<4x32x8xf32, #tpu.memory_space<vmem>>, vector<1x32x8xf32>
    %141 = vector.shape_cast %140 : vector<1x32x8xf32> to vector<32x8xf32>
    %cst_76 = arith.constant dense<0.000000e+00> : vector<32x8xf32>
    %142 = tpu.matmul %0, %141, %cst_76 {dimension_numbers = #tpu.dot_dimension_numbers<[1], [0], [0], [1], [0, 0, 1, 1], [], []>} : vector<32x32xf32>, vector<32x8xf32>, vector<32x8xf32> -> vector<32x8xf32>
    %cst_77 = arith.constant 0.353553385 : f32
    %143 = vector.broadcast %cst_77 : f32 to vector<32x8xf32>
    %144 = arith.mulf %142, %143 : vector<32x8xf32>
    %c3_78 = arith.constant 3 : index
    %c0_79 = arith.constant 0 : index
    %c0_80 = arith.constant 0 : index
    %145 = vector.load %arg3[%c3_78, %c0_79, %c0_80] : memref<4x32x8xf32, #tpu.memory_space<vmem>>, vector<1x32x8xf32>
    %146 = vector.shape_cast %145 : vector<1x32x8xf32> to vector<32x8xf32>
    %cst_81 = arith.constant dense<0.000000e+00> : vector<32x8xf32>
    %147 = tpu.matmul %0, %146, %cst_81 {dimension_numbers = #tpu.dot_dimension_numbers<[1], [0], [0], [1], [0, 0, 1, 1], [], []>} : vector<32x32xf32>, vector<32x8xf32>, vector<32x8xf32> -> vector<32x8xf32>
    %c3_82 = arith.constant 3 : index
    %c0_83 = arith.constant 0 : index
    %c0_84 = arith.constant 0 : index
    %148 = vector.load %arg4[%c3_82, %c0_83, %c0_84] : memref<4x32x8xf32, #tpu.memory_space<vmem>>, vector<1x32x8xf32>
    %149 = vector.shape_cast %148 : vector<1x32x8xf32> to vector<32x8xf32>
    %cst_85 = arith.constant dense<0.000000e+00> : vector<32x8xf32>
    %150 = tpu.matmul %0, %149, %cst_85 {dimension_numbers = #tpu.dot_dimension_numbers<[1], [0], [0], [1], [0, 0, 1, 1], [], []>} : vector<32x32xf32>, vector<32x8xf32>, vector<32x8xf32> -> vector<32x8xf32>
    %151 = vector.extract_strided_slice %144 {offsets = [0, 0], sizes = [16, 8], strides = [1, 1]} : vector<32x8xf32> to vector<16x8xf32>
    %152 = vector.extract_strided_slice %147 {offsets = [0, 0], sizes = [16, 8], strides = [1, 1]} : vector<32x8xf32> to vector<16x8xf32>
    %153 = vector.extract_strided_slice %150 {offsets = [0, 0], sizes = [16, 8], strides = [1, 1]} : vector<32x8xf32> to vector<16x8xf32>
    %cst_86 = arith.constant dense<0.000000e+00> : vector<16x16xf32>
    %154 = tpu.matmul %151, %152, %cst_86 {dimension_numbers = #tpu.dot_dimension_numbers<[1], [1], [0], [0], [0, 0, 1, 0], [], []>} : vector<16x8xf32>, vector<16x8xf32>, vector<16x16xf32> -> vector<16x16xf32>
    %cst_87 = arith.constant dense<0xFF800000> : vector<16xf32>
    %155 = vector.multi_reduction <maximumf>, %154, %cst_87 [1] : vector<16x16xf32> to vector<16xf32>
    %156 = vector.shape_cast %155 : vector<16xf32> to vector<16x1xf32>
    %157 = vector.broadcast %156 : vector<16x1xf32> to vector<16x16xf32>
    %158 = arith.subf %154, %157 : vector<16x16xf32>
    %159 = math.exp %158 : vector<16x16xf32>
    %cst_88 = arith.constant dense<0.000000e+00> : vector<16xf32>
    %160 = vector.multi_reduction <add>, %159, %cst_88 [1] : vector<16x16xf32> to vector<16xf32>
    %161 = vector.shape_cast %160 : vector<16xf32> to vector<16x1xf32>
    %162 = tpu.reciprocal %161 {approx = true} : vector<16x1xf32> -> vector<16x1xf32>
    %163 = vector.broadcast %162 : vector<16x1xf32> to vector<16x16xf32>
    %164 = arith.mulf %159, %163 : vector<16x16xf32>
    %cst_89 = arith.constant dense<0.000000e+00> : vector<16x8xf32>
    %165 = tpu.matmul %164, %153, %cst_89 {dimension_numbers = #tpu.dot_dimension_numbers<[1], [0], [0], [1], [0, 0, 1, 1], [], []>} : vector<16x16xf32>, vector<16x8xf32>, vector<16x8xf32> -> vector<16x8xf32>
    %166 = vector.extract_strided_slice %144 {offsets = [16, 0], sizes = [16, 8], strides = [1, 1]} : vector<32x8xf32> to vector<16x8xf32>
    %167 = vector.extract_strided_slice %147 {offsets = [16, 0], sizes = [16, 8], strides = [1, 1]} : vector<32x8xf32> to vector<16x8xf32>
    %168 = vector.extract_strided_slice %150 {offsets = [16, 0], sizes = [16, 8], strides = [1, 1]} : vector<32x8xf32> to vector<16x8xf32>
    %cst_90 = arith.constant dense<0.000000e+00> : vector<16x16xf32>
    %169 = tpu.matmul %166, %167, %cst_90 {dimension_numbers = #tpu.dot_dimension_numbers<[1], [1], [0], [0], [0, 0, 1, 0], [], []>} : vector<16x8xf32>, vector<16x8xf32>, vector<16x16xf32> -> vector<16x16xf32>
    %cst_91 = arith.constant dense<0xFF800000> : vector<16xf32>
    %170 = vector.multi_reduction <maximumf>, %169, %cst_91 [1] : vector<16x16xf32> to vector<16xf32>
    %171 = vector.shape_cast %170 : vector<16xf32> to vector<16x1xf32>
    %172 = vector.broadcast %171 : vector<16x1xf32> to vector<16x16xf32>
    %173 = arith.subf %169, %172 : vector<16x16xf32>
    %174 = math.exp %173 : vector<16x16xf32>
    %cst_92 = arith.constant dense<0.000000e+00> : vector<16xf32>
    %175 = vector.multi_reduction <add>, %174, %cst_92 [1] : vector<16x16xf32> to vector<16xf32>
    %176 = vector.shape_cast %175 : vector<16xf32> to vector<16x1xf32>
    %177 = tpu.reciprocal %176 {approx = true} : vector<16x1xf32> -> vector<16x1xf32>
    %178 = vector.broadcast %177 : vector<16x1xf32> to vector<16x16xf32>
    %179 = arith.mulf %174, %178 : vector<16x16xf32>
    %cst_93 = arith.constant dense<0.000000e+00> : vector<16x8xf32>
    %180 = tpu.matmul %179, %168, %cst_93 {dimension_numbers = #tpu.dot_dimension_numbers<[1], [0], [0], [1], [0, 0, 1, 1], [], []>} : vector<16x16xf32>, vector<16x8xf32>, vector<16x8xf32> -> vector<16x8xf32>
    %181 = tpu.concatenate %165, %180 in 0 : vector<16x8xf32>, vector<16x8xf32> -> vector<32x8xf32>
    %c3_94 = arith.constant 3 : index
    %c0_95 = arith.constant 0 : index
    %c0_96 = arith.constant 0 : index
    %182 = vector.load %arg5[%c3_94, %c0_95, %c0_96] : memref<4x8x128xf32, #tpu.memory_space<vmem>>, vector<1x8x128xf32>
    %183 = vector.shape_cast %182 : vector<1x8x128xf32> to vector<8x128xf32>
    %cst_97 = arith.constant dense<0.000000e+00> : vector<32x128xf32>
    %184 = tpu.matmul %181, %183, %cst_97 {dimension_numbers = #tpu.dot_dimension_numbers<[1], [0], [0], [1], [0, 0, 1, 1], [], []>} : vector<32x8xf32>, vector<8x128xf32>, vector<32x128xf32> -> vector<32x128xf32>
    %185 = arith.addf %139, %184 : vector<32x128xf32>
    %c0_98 = arith.constant 0 : index
    %c0_99 = arith.constant 0 : index
    %186 = vector.load %arg6[%c0_98, %c0_99] : memref<1x128xf32, #tpu.memory_space<vmem>>, vector<1x128xf32>
    %187 = vector.broadcast %186 : vector<1x128xf32> to vector<32x128xf32>
    %188 = arith.addf %185, %187 : vector<32x128xf32>
    %c0_100 = arith.constant 0 : index
    %c0_101 = arith.constant 0 : index
    %189 = vector.load %arg7[%c0_100, %c0_101] : memref<32x128xf32, #tpu.memory_space<vmem>>, vector<32x128xf32>
    tpu.vector_store %arg7[%c0_100, %c0_101], %188 {strides = array<i32>} : memref<32x128xf32, #tpu.memory_space<vmem>>, vector<32x128xf32>,
    return
  }
  func.func @transform_0(%arg0: i32) -> (i32, i32) {
    %c0_i32 = arith.constant 0 : i32
    %c0_i32_0 = arith.constant 0 : i32
    %c0_i32_1 = arith.constant 0 : i32
    return %c0_i32, %c0_i32_0 : i32, i32
  }
  func.func @transform_1(%arg0: i32) -> (i32, i32, i32) {
    %c0_i32 = arith.constant 0 : i32
    %c0_i32_0 = arith.constant 0 : i32
    %c0_i32_1 = arith.constant 0 : i32
    %c0_i32_2 = arith.constant 0 : i32
    return %c0_i32, %c0_i32_0, %c0_i32_1 : i32, i32, i32
  }
  func.func @transform_2(%arg0: i32) -> (i32, i32, i32) {
    %c0_i32 = arith.constant 0 : i32
    %c0_i32_0 = arith.constant 0 : i32
    %c0_i32_1 = arith.constant 0 : i32
    %c0_i32_2 = arith.constant 0 : i32
    return %c0_i32, %c0_i32_0, %c0_i32_1 : i32, i32, i32
  }
  func.func @transform_3(%arg0: i32) -> (i32, i32, i32) {
    %c0_i32 = arith.constant 0 : i32
    %c0_i32_0 = arith.constant 0 : i32
    %c0_i32_1 = arith.constant 0 : i32
    %c0_i32_2 = arith.constant 0 : i32
    return %c0_i32, %c0_i32_0, %c0_i32_1 : i32, i32, i32
  }
  func.func @transform_4(%arg0: i32) -> (i32, i32, i32) {
    %c0_i32 = arith.constant 0 : i32
    %c0_i32_0 = arith.constant 0 : i32
    %c0_i32_1 = arith.constant 0 : i32
    %c0_i32_2 = arith.constant 0 : i32
    return %c0_i32, %c0_i32_0, %c0_i32_1 : i32, i32, i32
  }
  func.func @transform_5(%arg0: i32) -> (i32, i32) {
    %c0_i32 = arith.constant 0 : i32
    %c0_i32_0 = arith.constant 0 : i32
    %c0_i32_1 = arith.constant 0 : i32
    return %c0_i32, %c0_i32_0 : i32, i32
  }
  func.func @transform_6(%arg0: i32) -> (i32, i32) {
    %c0_i32 = arith.constant 0 : i32
    %c0_i32_0 = arith.constant 0 : i32
    %c0_i32_1 = arith.constant 0 : i32
    return %c0_i32, %c0_i32_0 : i32, i32
  }
}

</mosaic_0001>

<bundles_post_ra>
// kernel: sablock_forward.1
= control target key start
LH: loop header
LB: loop body
LE: loop exit
PB: predicated region body
PF: predicated region fallthrough
CT: control target
= control target key end

     0   :  { %vm32_vm0 = vcmask 261120   ;;  %s4472_s0 = inlined_call_operand.vmem [shape: f32[32,32], index: 0, kind: input, shape index: {}]   ;;  %s4473_s1 = inlined_call_operand.vmem [shape: f32[4,32,8], index: 1, kind: input, shape index: {}]   ;;  %s4474_s2 = inlined_call_operand.vmem [shape: f32[4,32,8], index: 2, kind: input, shape index: {}]   ;;  %s4475_s3 = inlined_call_operand.vmem [shape: f32[4,32,8], index: 3, kind: input, shape index: {}]   ;;  %s4476_s4 = inlined_call_operand.vmem [shape: f32[4,8,128], index: 4, kind: input, shape index: {}]   ;;  %s4477_s5 = inlined_call_operand.vmem [shape: f32[1,128], index: 5, kind: input, shape index: {}]   ;;  %s4478_s6 = inlined_call_operand.hbm [shape: f32[32,128], index: 6, kind: output, shape index: {}]  }
   0x1   :  { %v134_v0 = vld [vmem:[%s4474_s2] sm:$0xff]  ;;  %v135_v1 = vld [vmem:[%s4474_s2 + $0x8] sm:$0xff]  ;;  %v136_v2 = vld [vmem:[%s4474_s2 + $0x10] sm:$0xff] }
   0x2   :  { %v3742_v3 = vpack.c.bf16 %v135_v1, %v134_v0  ;;  %v137_v4 = vld [vmem:[%s4474_s2 + $0x18] sm:$0xff]  ;;  %v28_v5 = vld [vmem:[%s4473_s1] sm:$0xff]  ;;  %v29_v6 = vld [vmem:[%s4473_s1 + $0x8] sm:$0xff] }
   0x3   :  { %v3746_v7 = vpack.c.bf16 %v137_v4, %v136_v2  ;;  %v3734_v8 = vpack.c.bf16 %v29_v6, %v28_v5  ;;  %v4072_v9 = vld [vmem:[%s4472_s0] sm:$0xff]  ;;  %v30_v10 = vld [vmem:[%s4473_s1 + $0x10] sm:$0xff]  ;;  %v31_v11 = vld [vmem:[%s4473_s1 + $0x18] sm:$0xff] }
   0x4   :  { %3743 = vmatprep.subr.bf16.mxu1 %v3742_v3  ;;  %3444 = vmatprep.mubr.msk.f32.mxu1 %vm32_vm0, %v4072_v9  ;;  %v3738_v12 = vpack.c.bf16 %v31_v11, %v30_v10  ;;  %v223_v13 = vld [vmem:[%s4475_s3] sm:$0xff]  ;;  %v224_v14 = vld [vmem:[%s4475_s3 + $0x8] sm:$0xff] }
   0x5   :  { %3745 = vmatpush3.bf16.msra.mxu1 %v3742_v3  ;;  %3735 = vmatprep.subr.bf16.mxu0 %v3734_v8 }
   0x6   :  { %3747 = vmatprep.subr.bf16.mxu1 %v3746_v7  ;;  %3737 = vmatpush3.bf16.msra.mxu0 %v3734_v8 }
   0x7   :  { %11 = vsyncpa [#allocation3], 0  ;;  %3739 = vmatprep.subr.bf16.mxu0 %v3738_v12  ;;  %3430 = vmatprep.mubr.msk.f32.mxu0 %vm32_vm0, %v4072_v9  ;;  %v3750_v15 = vpack.c.bf16 %v224_v14, %v223_v13  ;;  %v225_v16 = vld [vmem:[%s4475_s3 + $0x10] sm:$0xff]  ;;  %v226_v17 = vld [vmem:[%s4475_s3 + $0x18] sm:$0xff]  ;;  %vm312_vm1 = vcmask 64512   ;;  %vm400_vm3 = vcmask 130048  }
   0x8   :  { %v4099_v18 = vld [vmem:[%s4472_s0 + $0x8] sm:$0xff]  ;;  %v4104_v19 = vld [vmem:[%s4472_s0 + $0x10] sm:$0xff]  ;;  %v3754_v20 = vpack.c.bf16 %v226_v17, %v225_v16  ;;  %v4113_v21 = vld [vmem:[%s4472_s0 + $0x18] sm:$0xff]  ;;  %s4013_s7 = smov [#allocation2]  }
   0x9   :  { %3749 = vmatpush3.bf16.msra.mxu1 %v3746_v7  ;;  %vm4133_vm2 = vmpackc.low %vm312_vm1, %vm312_vm1  ;;  %v3114_v7 = vld [vmem:[%s4473_s1 + $0x20] sm:$0xff]  ;;  %v3115_v8 = vld [vmem:[%s4473_s1 + $0x28] sm:$0xff]  ;;  %s3079_s8 = sshll.u32 %s4013_s7, 4  ;;  %s3080_s8 = int_to_ptr.vmem [resolvable:$true] %s3079_s8 }
   0xa   :  { %3741 = vmatpush3.bf16.msra.mxu0 %v3738_v12  ;;  %v3778_v10 = vpack.c.bf16 %v3115_v8, %v3114_v7  ;;  %v3116_v11 = vld [vmem:[%s4473_s1 + $0x30] sm:$0xff]  ;;  %v3117_v12 = vld [vmem:[%s4473_s1 + $0x38] sm:$0xff]  ;;  %p3994_p1 = scmp.lt.s32.totalorder %s3080_s8, %s3080_s8 }
   0xb   :  { %3751 = vmatprep.subr.bf16.mxu0 %v3750_v15  ;;  %v3782_v13 = vpack.c.bf16 %v3117_v12, %v3116_v11 }
   0xc   :  { %3445 = vmatmul.mubr.msk.f32.vlgmr.msra.gmra.mrb[0].mxu1 %vm32_vm0, %v4099_v18 }
   0xd   :  { %3447 = vmatprep.mubr.msk.f32.mxu1 %vm32_vm0, %v4104_v19  ;;  %3431 = vmatmul.mubr.msk.f32.vlgmr.msra.gmra.mrb[0].mxu0 %vm32_vm0, %v4099_v18 }
   0xe   :  { %3433 = vmatprep.mubr.msk.f32.mxu0 %vm32_vm0, %v4104_v19  ;;  %3753 = vmatpush3.bf16.msra.mxu0 %v3750_v15 }
   0xf   :  { %3755 = vmatprep.subr.bf16.mxu0 %v3754_v20 }
  0x10   :  { %3448 = vmatmul.mubr.msk.f32.gmra.mrb[2].mxu1 %vm32_vm0, %v4113_v21 }
  0x11   :  { %3434 = vmatmul.mubr.msk.f32.gmra.mrb[2].mxu0 %vm32_vm0, %v4113_v21 }
  0x12   :  { %3757 = vmatpush3.bf16.msra.mxu0 %v3754_v20  ;;  %3458 = vmatprep.mubr.msk.f32.mxu0 %vm32_vm0, %v4072_v9 }
  0x15   :  { %3459 = vmatmul.mubr.msk.f32.vlgmr.msra.gmra.mrb[4].mxu0 %vm32_vm0, %v4099_v18 }
  0x16   :  { %3461 = vmatprep.mubr.msk.f32.mxu0 %vm32_vm0, %v4104_v19 }
  0x19   :  { %3462 = vmatmul.mubr.msk.f32.gmra.mrb[6].mxu0 %vm32_vm0, %v4113_v21 }
  0xdf   :  { %v3446_v22 = vpop.f32.mrb[0].mxu1 }
  0xe0   :  { %v204_v23 = vpop.f32.mrb[1].mxu1  ;;  %v3432_v25 = vpop.f32.mrb[0].mxu0 }
  0xe1   :  { %v3758_v26 = vpack.c.bf16 %v3446_v22, %v204_v23  ;;  %v111_v27 = vpop.f32.mrb[1].mxu0  ;;  %v131_v36 = vmul.f32 0.35355338, %v3432_v25  ;;  %v3122_v23 = vld [vmem:[%s4474_s2 + $0x20] sm:$0xff]  ;;  %v3123_v25 = vld [vmem:[%s4474_s2 + $0x28] sm:$0xff] }
  0xe2   :  { %v130_v28 = vmul.f32 0.35355338, %v111_v27 }
  0xe3   :  { %v3449_v29 = vpop.f32.mrb[2].mxu1  ;;  %3760 = vmatprep.subr.msk.bf16.mxu1 %vm4133_vm2, %v3758_v26 }
  0xe4   :  { %v214_v30 = vpop.f32.mrb[3].mxu1  ;;  %3763 = vmatpush3.bf16.xpose.msk.msra.mxu1 %vm4133_vm2, %v3758_v26  ;;  %v3435_v31 = vpop.f32.mrb[2].mxu0  ;;  %3468 = vmatprep.mubr.msk.f32.mxu1 %vm312_vm1, %v130_v28 }
  0xe5   :  { %v3768_v32 = vpack.c.bf16 %v3449_v29, %v214_v30  ;;  %v121_v33 = vpop.f32.mrb[3].mxu0  ;;  %v133_v40 = vmul.f32 0.35355338, %v3435_v31  ;;  %v3786_v29 = vpack.c.bf16 %v3123_v25, %v3122_v23  ;;  %v3124_v31 = vld [vmem:[%s4474_s2 + $0x30] sm:$0xff] }
  0xe6   :  { %v132_v34 = vmul.f32 0.35355338, %v121_v33 }
  0xe7   :  { %3770 = vmatprep.subr.msk.bf16.mxu0 %vm4133_vm2, %v3768_v32 }
  0xe8   :  { %3773 = vmatpush3.bf16.xpose.msk.msra.mxu0 %vm4133_vm2, %v3768_v32  ;;  %3482 = vmatprep.mubr.msk.f32.mxu0 %vm312_vm1, %v132_v34  ;;  %v3460_v35 = vpop.f32.mrb[4].mxu0  ;;  %v3125_v32 = vld [vmem:[%s4474_s2 + $0x38] sm:$0xff] }
  0xe9   :  { %v293_v37 = vpop.f32.mrb[5].mxu0  ;;  %3779 = vmatprep.subr.bf16.mxu0 %v3778_v10 }
  0xea   :  { %v3764_v38 = vpack.c.bf16 %v3460_v35, %v293_v37  ;;  %v3790_v35 = vpack.c.bf16 %v3125_v32, %v3124_v31  ;;  %v3131_v37 = vld [vmem:[%s4475_s3 + $0x28] sm:$0xff] }
  0xeb   :  { %3469 = vmatmul.mubr.msk.f32.vlgmr.msra.gmra.mrb[4].mxu1 %vm312_vm1, %v131_v36  ;;  %v3130_v36 = vld [vmem:[%s4475_s3 + $0x20] sm:$0xff] }
  0xec   :  { %3765 = vmatprep.subr.bf16.mxu1 %v3764_v38  ;;  %v3463_v39 = vpop.f32.mrb[6].mxu0 }
  0xed   :  { %3767 = vmatpush3.bf16.msra.mxu1 %v3764_v38  ;;  %v303_v41 = vpop.f32.mrb[7].mxu0  ;;  %v3794_v38 = vpack.c.bf16 %v3131_v37, %v3130_v36 }
  0xee   :  { %v4148_v42 = vpack.c.bf16 %v3463_v39, %v303_v41  ;;  %v3132_v39 = vld [vmem:[%s4475_s3 + $0x30] sm:$0xff] }
  0xef   :  { %3483 = vmatmul.mubr.msk.f32.vlgmr.msra.gmra.mrb[8].mxu0 %vm312_vm1, %v133_v40  ;;  %v3133_v40 = vld [vmem:[%s4475_s3 + $0x38] sm:$0xff] }
  0xf0   :  { %3775 = vmatprep.subr.bf16.mxu1 %v4148_v42  ;;  %3500 = vmatprep.mubr.msk.f32.mxu0 %vm32_vm0, %v4072_v9  ;;  %v3798_v41 = vpack.c.bf16 %v3133_v40, %v3132_v39 }
  0xf1   :  { %3781 = vmatpush3.bf16.msra.mxu0 %v3778_v10 }
  0xf2   :  { %3783 = vmatprep.subr.bf16.mxu0 %v3782_v13 }
  0xf5   :  { %3785 = vmatpush3.bf16.msra.mxu0 %v3782_v13 }
  0xf6   :  { %3795 = vmatprep.subr.bf16.mxu0 %v3794_v38 }
  0xf8   :  { %3501 = vmatmul.mubr.msk.f32.vlgmr.msra.gmra.mrb[10].mxu0 %vm32_vm0, %v4099_v18 }
  0xf9   :  { %3503 = vmatprep.mubr.msk.f32.mxu0 %vm32_vm0, %v4104_v19  ;;  %3797 = vmatpush3.bf16.msra.mxu0 %v3794_v38 }
  0xfa   :  { %3799 = vmatprep.subr.bf16.mxu0 %v3798_v41 }
  0xfc   :  { %3504 = vmatmul.mubr.msk.f32.gmra.mrb[12].mxu0 %vm32_vm0, %v4113_v21 }
  0xfd   :  { %3528 = vmatprep.mubr.msk.f32.mxu0 %vm32_vm0, %v4072_v9  ;;  %3801 = vmatpush3.bf16.msra.mxu0 %v3798_v41 }
 0x100   :  { %3529 = vmatmul.mubr.msk.f32.vlgmr.msra.gmra.mrb[14].mxu0 %vm32_vm0, %v4099_v18 }
 0x101   :  { %3531 = vmatprep.mubr.msk.f32.mxu0 %vm32_vm0, %v4104_v19 }
 0x104   :  { %3532 = vmatmul.mubr.msk.f32.gmra.mrb[16].mxu0 %vm32_vm0, %v4113_v21 }
 0x1be   :  { %v3470_v43 = vpop.f32.mrb[4].mxu1 }
 0x1bf   :  { %v391_v44 = vpop.f32.mrb[5].mxu1  ;;  %v404_v48 = vsel %vm400_vm3, %v3470_v43, -inf }
 0x1c0   :  { %v401_v45 = vsel %vm400_vm3, %v391_v44, -inf }
 0x1c1   :  { %402 = vmax.xlane.f32.xlu0 %v401_v45 }
 0x1c2   :  { %v3484_v46 = vpop.f32.mrb[8].mxu0 }
 0x1c3   :  { %v582_v47 = vpop.f32.mrb[9].mxu0  ;;  %v594_v50 = vsel %vm400_vm3, %v3484_v46, -inf }
 0x1c4   :  { %v591_v49 = vsel %vm400_vm3, %v582_v47, -inf }
 0x1c5   :  { %405 = vmax.xlane.f32.xlu0 %v404_v48  ;;  %592 = vmax.xlane.f32.xlu1 %v591_v49 }
 0x1c9   :  { %595 = vmax.xlane.f32.xlu1 %v594_v50 }
 0x24e   :  { %v403_v51 = vpop.xlane.xlu0 %402 }
 0x24f   :  { %v407_v52 = vsub.f32 %v391_v44, %v403_v51 }
 0x251   :  { %v409_v53 = vmul.f32 1.442695, %v407_v52 }
 0x252   :  { %v406_v54 = vpop.xlane.xlu0 %405  ;;  %v593_v55 = vpop.xlane.xlu1 %592 }
 0x253   :  { %3925 = vpow2.f32 %v409_v53  ;;  %v408_v56 = vsub.f32 %v3470_v43, %v406_v54  ;;  %v597_v57 = vsub.f32 %v582_v47, %v593_v55 }
 0x255   :  { %v411_v58 = vmul.f32 1.442695, %v408_v56  ;;  %v599_v59 = vmul.f32 1.442695, %v597_v57 }
 0x256   :  { %v596_v60 = vpop.xlane.xlu1 %595 }
 0x257   :  { %3927 = vpow2.f32 %v411_v58  ;;  %v598_v61 = vsub.f32 %v3484_v46, %v596_v60  ;;  %v694_v58 = vld [vmem:[%s4476_s4] sm:$0xff] }
 0x258   :  { %3929 = vpow2.f32 %v599_v59 }
 0x259   :  { %v601_v62 = vmul.f32 1.442695, %v598_v61 }
 0x25b   :  { %3931 = vpow2.f32 %v601_v62 }
 0x25d   :  { %v3926_v63 = vpop.eup %3925 }
 0x25e   :  { %v413_v0 = vsel %vm400_vm3, %v3926_v63, 0.0 }
 0x25f   :  { %414 = vadd.xlane.f32.xlu0 %v413_v0 }
 0x261   :  { %v3928_v1 = vpop.eup %3927 }
 0x262   :  { %v3930_v2 = vpop.eup %3929  ;;  %v416_v3 = vsel %vm400_vm3, %v3928_v1, 0.0 }
 0x263   :  { %417 = vadd.xlane.f32.xlu1 %v416_v3  ;;  %v603_v4 = vsel %vm400_vm3, %v3930_v2, 0.0 }
 0x264   :  { %604 = vadd.xlane.f32.xlu0 %v603_v4 }
 0x265   :  { %v3932_v5 = vpop.eup %3931 }
 0x266   :  { %v606_v6 = vsel %vm400_vm3, %v3932_v5, 0.0 }
 0x267   :  { %607 = vadd.xlane.f32.xlu1 %v606_v6 }
 0x2ec   :  { %v415_v14 = vpop.xlane.xlu0 %414 }
 0x2ed   :  { %3933 = vrcp.f32 %v415_v14 }
 0x2f0   :  { %v418_v15 = vpop.xlane.xlu1 %417 }
 0x2f1   :  { %v605_v16 = vpop.xlane.xlu0 %604  ;;  %3935 = vrcp.f32 %v418_v15 }
 0x2f2   :  { %3937 = vrcp.f32 %v605_v16 }
 0x2f4   :  { %v608_v17 = vpop.xlane.xlu1 %607 }
 0x2f5   :  { %3939 = vrcp.f32 %v608_v17 }
 0x2f7   :  { %v3934_v20 = vpop.eup %3933 }
 0x2f8   :  { %v421_v22 = vmul.f32 %v3934_v20, %v3926_v63 }
 0x2fa   :  { %3475 = vmatprep.mubr.msk.f32.mxu1 %vm400_vm3, %v421_v22 }
 0x2fb   :  { %v3936_v26 = vpop.eup %3935 }
 0x2fc   :  { %v3938_v27 = vpop.eup %3937  ;;  %v422_v28 = vmul.f32 %v3936_v26, %v3928_v1 }
 0x2fd   :  { %v611_v30 = vmul.f32 %v3938_v27, %v3930_v2 }
 0x2fe   :  { %3476 = vmatmul.mubr.msk.f32.vlgmr.msra.gmra.mrb[6].mxu1 %vm400_vm3, %v422_v28 }
 0x2ff   :  { %v3940_v33 = vpop.eup %3939  ;;  %3777 = vmatpush3.bf16.msra.mxu1 %v4148_v42  ;;  %3489 = vmatprep.mubr.msk.f32.mxu1 %vm400_vm3, %v611_v30  ;;  %v3502_v42 = vpop.f32.mrb[10].mxu0 }
 0x300   :  { %v612_v34 = vmul.f32 %v3940_v33, %v3932_v5  ;;  %3787 = vmatprep.subr.bf16.mxu1 %v3786_v29  ;;  %v766_v43 = vpop.f32.mrb[11].mxu0  ;;  %v786_v59 = vmul.f32 0.35355338, %v3502_v42 }
 0x301   :  { %v785_v44 = vmul.f32 0.35355338, %v766_v43  ;;  %v3505_v45 = vpop.f32.mrb[12].mxu0 }
 0x302   :  { %3490 = vmatmul.mubr.msk.f32.vlgmr.msra.gmra.mrb[8].mxu1 %vm400_vm3, %v612_v34  ;;  %v776_v46 = vpop.f32.mrb[13].mxu0  ;;  %v788_v60 = vmul.f32 0.35355338, %v3505_v45  ;;  %v3150_v45 = vld [vmem:[%s4476_s4 + $0x8] sm:$0xff] }
 0x303   :  { %3789 = vmatpush3.bf16.msra.mxu1 %v3786_v29  ;;  %3514 = vmatprep.mubr.msk.f32.mxu1 %vm32_vm0, %v4072_v9  ;;  %v787_v47 = vmul.f32 0.35355338, %v776_v46  ;;  %v3530_v61 = vpop.f32.mrb[14].mxu0 }
 0x304   :  { %3791 = vmatprep.subr.bf16.mxu1 %v3790_v35  ;;  %v950_v62 = vpop.f32.mrb[15].mxu0 }
 0x305   :  { %3552 = vmatprep.mubr.msk.f32.mxu0 %vm312_vm1, %v787_v47  ;;  %v3808_v63 = vpack.c.bf16 %v3530_v61, %v950_v62  ;;  %v3533_v0 = vpop.f32.mrb[16].mxu0  ;;  %v3169_v62 = vld [vmem:[%s4474_s2 + $0x50] sm:$0xff] }
 0x306   :  { %v960_v1 = vpop.f32.mrb[17].mxu0 }
 0x307   :  { %3793 = vmatpush3.bf16.msra.mxu1 %v3790_v35  ;;  %v3818_v2 = vpack.c.bf16 %v3533_v0, %v960_v1 }
 0x30a   :  { %3515 = vmatmul.mubr.msk.f32.vlgmr.msra.gmra.mrb[10].mxu1 %vm32_vm0, %v4099_v18 }
 0x30b   :  { %3517 = vmatprep.mubr.msk.f32.mxu1 %vm32_vm0, %v4104_v19 }
 0x30e   :  { %3518 = vmatmul.mubr.msk.f32.gmra.mrb[12].mxu1 %vm32_vm0, %v4113_v21 }
 0x30f   :  { %3538 = vmatprep.mubr.msk.f32.mxu1 %vm312_vm1, %v785_v44 }
 0x3d1   :  { %v3477_v48 = vpop.f32.mrb[6].mxu1 }
 0x3d2   :  { %v495_v49 = vpop.f32.mrb[7].mxu1 }
 0x3d5   :  { %v3491_v50 = vpop.f32.mrb[8].mxu1 }
 0x3d6   :  { %v685_v51 = vpop.f32.mrb[9].mxu1 }
 0x3dd   :  { %v3516_v52 = vpop.f32.mrb[10].mxu1 }
 0x3de   :  { %v860_v53 = vpop.f32.mrb[11].mxu1 }
 0x3df   :  { %v3802_v54 = vpack.c.bf16 %v3516_v52, %v860_v53  ;;  %v3161_v52 = vld [vmem:[%s4473_s1 + $0x50] sm:$0xff]  ;;  %v3162_v53 = vld [vmem:[%s4473_s1 + $0x58] sm:$0xff] }
 0x3e1   :  { %v3519_v55 = vpop.f32.mrb[12].mxu1  ;;  %3804 = vmatprep.subr.msk.bf16.mxu1 %vm4133_vm2, %v3802_v54 }
 0x3e2   :  { %v870_v56 = vpop.f32.mrb[13].mxu1  ;;  %3807 = vmatpush3.bf16.xpose.msk.msra.mxu1 %vm4133_vm2, %v3802_v54 }
 0x3e3   :  { %v3812_v57 = vpack.c.bf16 %v3519_v55, %v870_v56  ;;  %3809 = vmatprep.subr.bf16.mxu1 %v3808_v63  ;;  %v3826_v56 = vpack.c.bf16 %v3162_v53, %v3161_v52 }
 0x3e5   :  { %3814 = vmatprep.subr.msk.bf16.mxu0 %vm4133_vm2, %v3812_v57 }
 0x3e6   :  { %3817 = vmatpush3.bf16.xpose.msk.msra.mxu0 %vm4133_vm2, %v3812_v57  ;;  %v3167_v57 = vld [vmem:[%s4474_s2 + $0x40] sm:$0xff] }
 0x3e7   :  { %3570 = vmatprep.subr.mxu0 %v694_v58 }
 0x3e9   :  { %3539 = vmatmul.mubr.msk.f32.vlgmr.msra.gmra.mrb[14].mxu1 %vm312_vm1, %v786_v59 }
 0x3ea   :  { %3811 = vmatpush3.bf16.msra.mxu1 %v3808_v63  ;;  %v3170_v63 = vld [vmem:[%s4474_s2 + $0x58] sm:$0xff] }
 0x3eb   :  { %3819 = vmatprep.subr.bf16.mxu1 %v3818_v2  ;;  %v3834_v0 = vpack.c.bf16 %v3170_v63, %v3169_v62 }
 0x3ed   :  { %3553 = vmatmul.mubr.msk.f32.vlgmr.msra.gmra.mrb[18].mxu0 %vm312_vm1, %v788_v60 }
 0x3ee   :  { %3572 = vmatprep.mubr.msk.f32.mxu0 %vm312_vm1, %v495_v49  ;;  %3571 = vmatpush3.msra.mxu0 %v694_v58  ;;  %v3159_v49 = vld [vmem:[%s4473_s1 + $0x40] sm:$0xff]  ;;  %v3168_v58 = vld [vmem:[%s4474_s2 + $0x48] sm:$0xff] }
 0x3ef   :  { %v3830_v61 = vpack.c.bf16 %v3168_v58, %v3167_v57 }
 0x3f1   :  { %3573 = vmatmul.mubr.msk.f32.vlgmr.msra.gmra.mrb[20].mxu0 %vm312_vm1, %v3477_v48 }
 0x3f2   :  { %3575 = vmatprep.mubr.msk.f32.mxu0 %vm312_vm1, %v685_v51 }
 0x3f5   :  { %3576 = vmatmul.mubr.msk.f32.gmra.mrb[22].mxu0 %vm312_vm1, %v3491_v50  ;;  %v3160_v50 = vld [vmem:[%s4473_s1 + $0x48] sm:$0xff] }
 0x3f6   :  { %3614 = vmatprep.mubr.msk.f32.mxu0 %vm32_vm0, %v4072_v9  ;;  %v3822_v51 = vpack.c.bf16 %v3160_v50, %v3159_v49 }
 0x4bc   :  { %v3540_v3 = vpop.f32.mrb[14].mxu1 }
 0x4bd   :  { %v1047_v4 = vpop.f32.mrb[15].mxu1  ;;  %v1059_v5 = vsel %vm400_vm3, %v3540_v3, -inf }
 0x4be   :  { %1060 = vmax.xlane.f32.xlu1 %v1059_v5  ;;  %v1056_v6 = vsel %vm400_vm3, %v1047_v4, -inf }
 0x4bf   :  { %1057 = vmax.xlane.f32.xlu0 %v1056_v6 }
 0x4c0   :  { %v3554_v7 = vpop.f32.mrb[18].mxu0 }
 0x4c1   :  { %v1237_v8 = vpop.f32.mrb[19].mxu0  ;;  %v1249_v10 = vsel %vm400_vm3, %v3554_v7, -inf }
 0x4c2   :  { %1250 = vmax.xlane.f32.xlu1 %v1249_v10  ;;  %v1246_v11 = vsel %vm400_vm3, %v1237_v8, -inf }
 0x4c3   :  { %1247 = vmax.xlane.f32.xlu0 %v1246_v11 }
 0x54b   :  { %v1061_v12 = vpop.xlane.xlu1 %1060 }
 0x54c   :  { %v1063_v13 = vsub.f32 %v3540_v3, %v1061_v12  ;;  %v1058_v14 = vpop.xlane.xlu0 %1057 }
 0x54d   :  { %v1062_v15 = vsub.f32 %v1047_v4, %v1058_v14 }
 0x54e   :  { %v1066_v16 = vmul.f32 1.442695, %v1063_v13 }
 0x54f   :  { %v1064_v17 = vmul.f32 1.442695, %v1062_v15  ;;  %v1251_v20 = vpop.xlane.xlu1 %1250 }
 0x550   :  { %3941 = vpow2.f32 %v1066_v16  ;;  %v1253_v22 = vsub.f32 %v3554_v7, %v1251_v20  ;;  %v1248_v23 = vpop.xlane.xlu0 %1247 }
 0x551   :  { %3943 = vpow2.f32 %v1064_v17  ;;  %v1252_v25 = vsub.f32 %v1237_v8, %v1248_v23  ;;  %v3175_v23 = vld [vmem:[%s4475_s3 + $0x40] sm:$0xff] }
 0x552   :  { %v1256_v26 = vmul.f32 1.442695, %v1253_v22 }
 0x553   :  { %v1254_v27 = vmul.f32 1.442695, %v1252_v25  ;;  %v3176_v25 = vld [vmem:[%s4475_s3 + $0x48] sm:$0xff] }
 0x554   :  { %3945 = vpow2.f32 %v1256_v26  ;;  %v3177_v26 = vld [vmem:[%s4475_s3 + $0x50] sm:$0xff] }
 0x555   :  { %3947 = vpow2.f32 %v1254_v27  ;;  %v3838_v27 = vpack.c.bf16 %v3176_v25, %v3175_v23  ;;  %v3200_v25 = vld [vmem:[%s4473_s1 + $0x60] sm:$0xff] }
 0x557   :  { %3839 = vmatprep.subr.bf16.mxu0 %v3838_v27 }
 0x558   :  { %3841 = vmatpush3.bf16.msra.mxu0 %v3838_v27 }
 0x55a   :  { %v3942_v28 = vpop.eup %3941 }
 0x55b   :  { %v3944_v29 = vpop.eup %3943  ;;  %v1071_v30 = vsel %vm400_vm3, %v3942_v28, 0.0 }
 0x55c   :  { %1072 = vadd.xlane.f32.xlu1 %v1071_v30  ;;  %v1068_v31 = vsel %vm400_vm3, %v3944_v29, 0.0 }
 0x55d   :  { %1069 = vadd.xlane.f32.xlu0 %v1068_v31 }
 0x55e   :  { %v3946_v32 = vpop.eup %3945 }
 0x55f   :  { %v3948_v33 = vpop.eup %3947  ;;  %v1261_v34 = vsel %vm400_vm3, %v3946_v32, 0.0 }
 0x560   :  { %1262 = vadd.xlane.f32.xlu1 %v1261_v34  ;;  %v1258_v35 = vsel %vm400_vm3, %v3948_v33, 0.0 }
 0x561   :  { %1259 = vadd.xlane.f32.xlu0 %v1258_v35 }
 0x5e9   :  { %v1073_v36 = vpop.xlane.xlu1 %1072 }
 0x5ea   :  { %3949 = vrcp.f32 %v1073_v36  ;;  %v1070_v37 = vpop.xlane.xlu0 %1069 }
 0x5eb   :  { %3951 = vrcp.f32 %v1070_v37 }
 0x5ed   :  { %v1263_v38 = vpop.xlane.xlu1 %1262 }
 0x5ee   :  { %3953 = vrcp.f32 %v1263_v38  ;;  %v1260_v39 = vpop.xlane.xlu0 %1259 }
 0x5ef   :  { %3955 = vrcp.f32 %v1260_v39 }
 0x5f4   :  { %v3950_v40 = vpop.eup %3949 }
 0x5f5   :  { %v3952_v41 = vpop.eup %3951  ;;  %v1077_v43 = vmul.f32 %v3950_v40, %v3942_v28  ;;  %v3178_v28 = vld [vmem:[%s4475_s3 + $0x58] sm:$0xff] }
 0x5f6   :  { %v1076_v42 = vmul.f32 %v3952_v41, %v3944_v29  ;;  %v3842_v29 = vpack.c.bf16 %v3178_v28, %v3177_v26  ;;  %v3201_v26 = vld [vmem:[%s4473_s1 + $0x68] sm:$0xff]  ;;  %v3202_v28 = vld [vmem:[%s4473_s1 + $0x70] sm:$0xff] }
 0x5f7   :  { %v3866_v27 = vpack.c.bf16 %v3201_v26, %v3200_v25 }
 0x5f8   :  { %v3954_v44 = vpop.eup %3953  ;;  %3545 = vmatprep.mubr.msk.f32.mxu1 %vm400_vm3, %v1076_v42  ;;  %3843 = vmatprep.subr.bf16.mxu0 %v3842_v29 }
 0x5f9   :  { %v3956_v46 = vpop.eup %3955  ;;  %3546 = vmatmul.mubr.msk.f32.vlgmr.msra.gmra.mrb[16].mxu1 %vm400_vm3, %v1077_v43  ;;  %v1267_v48 = vmul.f32 %v3954_v44, %v3946_v32  ;;  %3845 = vmatpush3.bf16.msra.mxu0 %v3842_v29  ;;  %v3203_v29 = vld [vmem:[%s4473_s1 + $0x78] sm:$0xff] }
 0x5fa   :  { %3821 = vmatpush3.bf16.msra.mxu1 %v3818_v2  ;;  %v1266_v47 = vmul.f32 %v3956_v46, %v3948_v33 }
 0x5fb   :  { %3562 = vmatprep.subr.mxu1 %v3150_v45 }
 0x5fc   :  { %3559 = vmatprep.mubr.msk.f32.mxu1 %vm400_vm3, %v1266_v47  ;;  %3615 = vmatmul.mubr.msk.f32.vlgmr.msra.gmra.mrb[24].mxu0 %vm32_vm0, %v4099_v18 }
 0x5fd   :  { %3560 = vmatmul.mubr.msk.f32.vlgmr.msra.gmra.mrb[18].mxu1 %vm400_vm3, %v1267_v48  ;;  %3617 = vmatprep.mubr.msk.f32.mxu0 %vm32_vm0, %v4104_v19 }
 0x5fe   :  { %3563 = vmatpush3.msra.mxu1 %v3150_v45 }
 0x5ff   :  { %3823 = vmatprep.subr.bf16.mxu1 %v3822_v51 }
 0x600   :  { %3618 = vmatmul.mubr.msk.f32.gmra.mrb[26].mxu0 %vm32_vm0, %v4113_v21 }
 0x6cc   :  { %v3547_v54 = vpop.f32.mrb[16].mxu1 }
 0x6cd   :  { %v1150_v55 = vpop.f32.mrb[17].mxu1 }
 0x6ce   :  { %3564 = vmatprep.mubr.msk.f32.mxu1 %vm312_vm1, %v1150_v55 }
 0x6cf   :  { %3565 = vmatmul.mubr.msk.f32.vlgmr.msra.gmra.mrb[20].mxu1 %vm312_vm1, %v3547_v54  ;;  %v3616_v58 = vpop.f32.mrb[24].mxu0 }
 0x6d0   :  { %v3561_v59 = vpop.f32.mrb[18].mxu1  ;;  %3825 = vmatpush3.bf16.msra.mxu1 %v3822_v51 }
 0x6d1   :  { %v1340_v60 = vpop.f32.mrb[19].mxu1  ;;  %3827 = vmatprep.subr.bf16.mxu1 %v3826_v56 }
 0x6d2   :  { %3567 = vmatprep.mubr.msk.f32.mxu1 %vm312_vm1, %v1340_v60 }
 0x6d3   :  { %3568 = vmatmul.mubr.msk.f32.gmra.mrb[22].mxu1 %vm312_vm1, %v3561_v59  ;;  %v1800_v59 = vpop.f32.mrb[25].mxu0 }
 0x6d4   :  { %3829 = vmatpush3.bf16.msra.mxu1 %v3826_v56  ;;  %3586 = vmatprep.mubr.msk.f32.mxu1 %vm32_vm0, %v4072_v9  ;;  %v3852_v60 = vpack.c.bf16 %v3616_v58, %v1800_v59 }
 0x6d5   :  { %3831 = vmatprep.subr.bf16.mxu1 %v3830_v61 }
 0x6d6   :  { %3853 = vmatprep.subr.bf16.mxu0 %v3852_v60 }
 0x6d7   :  { %3587 = vmatmul.mubr.msk.f32.vlgmr.msra.gmra.mrb[24].mxu1 %vm32_vm0, %v4099_v18  ;;  %3855 = vmatpush3.bf16.msra.mxu0 %v3852_v60 }
 0x6d8   :  { %3833 = vmatpush3.bf16.msra.mxu1 %v3830_v61  ;;  %3589 = vmatprep.mubr.msk.f32.mxu1 %vm32_vm0, %v4104_v19  ;;  %v3619_v61 = vpop.f32.mrb[26].mxu0 }
 0x6d9   :  { %3835 = vmatprep.subr.bf16.mxu1 %v3834_v0  ;;  %v1810_v62 = vpop.f32.mrb[27].mxu0 }
 0x6da   :  { %v3862_v63 = vpack.c.bf16 %v3619_v61, %v1810_v62 }
 0x6db   :  { %3590 = vmatmul.mubr.msk.f32.gmra.mrb[26].mxu1 %vm32_vm0, %v4113_v21 }
 0x6dc   :  { %3837 = vmatpush3.bf16.msra.mxu1 %v3834_v0  ;;  %3600 = vmatprep.mubr.msk.f32.mxu1 %vm32_vm0, %v4072_v9 }
 0x6dd   :  { %3863 = vmatprep.subr.bf16.mxu0 %v3862_v63 }
 0x6df   :  { %3601 = vmatmul.mubr.msk.f32.vlgmr.msra.gmra.mrb[28].mxu1 %vm32_vm0, %v4099_v18 }
 0x6e0   :  { %3603 = vmatprep.mubr.msk.f32.mxu1 %vm32_vm0, %v4104_v19 }
 0x6e3   :  { %3604 = vmatmul.mubr.msk.f32.gmra.mrb[30].mxu1 %vm32_vm0, %v4113_v21 }
 0x7a2   :  { %v4305_v1 = vpop.f32.mrb[20].mxu1 }
 0x7a3   :  { %v4307_v2 = vpop.f32.mrb[21].mxu1 }
 0x7a6   :  { %v4309_v3 = vpop.f32.mrb[22].mxu1 }
 0x7a7   :  { %v4311_v4 = vpop.f32.mrb[23].mxu1 }
 0x7aa   :  { %v3588_v5 = vpop.f32.mrb[24].mxu1 }
 0x7ab   :  { %v1616_v6 = vpop.f32.mrb[25].mxu1  ;;  %v1636_v17 = vmul.f32 0.35355338, %v3588_v5 }
 0x7ac   :  { %v1635_v7 = vmul.f32 0.35355338, %v1616_v6 }
 0x7ae   :  { %v3591_v8 = vpop.f32.mrb[26].mxu1  ;;  %3624 = vmatprep.mubr.msk.f32.mxu1 %vm312_vm1, %v1635_v7 }
 0x7af   :  { %v1626_v10 = vpop.f32.mrb[27].mxu1  ;;  %v1638_v22 = vmul.f32 0.35355338, %v3591_v8 }
 0x7b0   :  { %v1637_v20 = vmul.f32 0.35355338, %v1626_v10 }
 0x7b2   :  { %v3602_v11 = vpop.f32.mrb[28].mxu1 }
 0x7b3   :  { %v1710_v12 = vpop.f32.mrb[29].mxu1 }
 0x7b4   :  { %v3846_v13 = vpack.c.bf16 %v3602_v11, %v1710_v12 }
 0x7b6   :  { %3848 = vmatprep.subr.msk.bf16.mxu1 %vm4133_vm2, %v3846_v13  ;;  %v3605_v14 = vpop.f32.mrb[30].mxu1 }
 0x7b7   :  { %3851 = vmatpush3.bf16.xpose.msk.msra.mxu1 %vm4133_vm2, %v3846_v13  ;;  %v1720_v15 = vpop.f32.mrb[31].mxu1 }
 0x7b8   :  { %v3856_v16 = vpack.c.bf16 %v3605_v14, %v1720_v15 }
 0x7ba   :  { %3858 = vmatprep.subr.msk.bf16.mxu1 %vm4133_vm2, %v3856_v16 }
 0x7be   :  { %3625 = vmatmul.mubr.msk.f32.vlgmr.msra.gmra.mrb[32].mxu1 %vm312_vm1, %v1636_v17  ;;  %v3195_v17 = vld [vmem:[%s4476_s4 + $0x10] sm:$0xff] }
 0x7bf   :  { %3861 = vmatpush3.bf16.xpose.msk.msra.mxu1 %vm4133_vm2, %v3856_v16  ;;  %3638 = vmatprep.mubr.msk.f32.mxu1 %vm312_vm1, %v1637_v20  ;;  %v3208_v20 = vld [vmem:[%s4474_s2 + $0x60] sm:$0xff] }
 0x7c0   :  { %3867 = vmatprep.subr.bf16.mxu1 %v3866_v27 }
 0x7c6   :  { %3639 = vmatmul.mubr.msk.f32.vlgmr.msra.gmra.mrb[34].mxu1 %vm312_vm1, %v1638_v22  ;;  %v3209_v22 = vld [vmem:[%s4474_s2 + $0x68] sm:$0xff] }
 0x7c7   :  { %3664 = vmatprep.mubr.msk.f32.mxu1 %vm32_vm0, %v4072_v9  ;;  %v3874_v23 = vpack.c.bf16 %v3209_v22, %v3208_v20  ;;  %3869 = vmatpush3.bf16.msra.mxu1 %v3866_v27 }
 0x891   :  { %v3626_v30 = vpop.f32.mrb[32].mxu1 }
 0x892   :  { %v1897_v31 = vpop.f32.mrb[33].mxu1  ;;  %v1909_v32 = vsel %vm400_vm3, %v3626_v30, -inf }
 0x893   :  { %1910 = vmax.xlane.f32.xlu1 %v1909_v32  ;;  %v1906_v33 = vsel %vm400_vm3, %v1897_v31, -inf  ;;  %v3217_v32 = vld [vmem:[%s4475_s3 + $0x68] sm:$0xff] }
 0x894   :  { %1907 = vmax.xlane.f32.xlu0 %v1906_v33  ;;  %v3218_v33 = vld [vmem:[%s4475_s3 + $0x70] sm:$0xff] }
 0x899   :  { %v3640_v34 = vpop.f32.mrb[34].mxu1 }
 0x89a   :  { %v2087_v35 = vpop.f32.mrb[35].mxu1  ;;  %v2099_v36 = vsel %vm400_vm3, %v3640_v34, -inf }
 0x89b   :  { %2100 = vmax.xlane.f32.xlu1 %v2099_v36  ;;  %v2096_v37 = vsel %vm400_vm3, %v2087_v35, -inf }
 0x89c   :  { %2097 = vmax.xlane.f32.xlu0 %v2096_v37  ;;  %v3210_v37 = vld [vmem:[%s4474_s2 + $0x70] sm:$0xff] }
 0x920   :  { %v1911_v38 = vpop.xlane.xlu1 %1910 }
 0x921   :  { %v1913_v39 = vsub.f32 %v3626_v30, %v1911_v38  ;;  %v1908_v40 = vpop.xlane.xlu0 %1907  ;;  %v3870_v30 = vpack.c.bf16 %v3203_v29, %v3202_v28  ;;  %v3211_v38 = vld [vmem:[%s4474_s2 + $0x78] sm:$0xff] }
 0x922   :  { %v1912_v41 = vsub.f32 %v1897_v31, %v1908_v40  ;;  %v3216_v31 = vld [vmem:[%s4475_s3 + $0x60] sm:$0xff] }
 0x923   :  { %v1916_v42 = vmul.f32 1.442695, %v1913_v39  ;;  %3871 = vmatprep.subr.bf16.mxu1 %v3870_v30 }
 0x924   :  { %v1914_v43 = vmul.f32 1.442695, %v1912_v41  ;;  %3873 = vmatpush3.bf16.msra.mxu1 %v3870_v30  ;;  %v3878_v41 = vpack.c.bf16 %v3211_v38, %v3210_v37 }
 0x925   :  { %3957 = vpow2.f32 %v1916_v42 }
 0x926   :  { %3959 = vpow2.f32 %v1914_v43 }
 0x927   :  { %3665 = vmatmul.mubr.msk.f32.vlgmr.msra.gmra.mrb[36].mxu1 %vm32_vm0, %v4099_v18 }
 0x928   :  { %v2101_v44 = vpop.xlane.xlu1 %2100  ;;  %3667 = vmatprep.mubr.msk.f32.mxu1 %vm32_vm0, %v4104_v19 }
 0x929   :  { %v2103_v45 = vsub.f32 %v3640_v34, %v2101_v44  ;;  %v2098_v46 = vpop.xlane.xlu0 %2097  ;;  %v3882_v34 = vpack.c.bf16 %v3217_v32, %v3216_v31 }
 0x92a   :  { %v2102_v47 = vsub.f32 %v2087_v35, %v2098_v46  ;;  %v3219_v35 = vld [vmem:[%s4475_s3 + $0x78] sm:$0xff] }
 0x92b   :  { %v2106_v48 = vmul.f32 1.442695, %v2103_v45  ;;  %v3886_v36 = vpack.c.bf16 %v3219_v35, %v3218_v33  ;;  %3883 = vmatprep.subr.bf16.mxu1 %v3882_v34  ;;  %3668 = vmatmul.mubr.msk.f32.gmra.mrb[38].mxu1 %vm32_vm0, %v4113_v21 }
 0x92c   :  { %v2104_v49 = vmul.f32 1.442695, %v2102_v47  ;;  %3885 = vmatpush3.bf16.msra.mxu1 %v3882_v34  ;;  %3692 = vmatprep.mubr.msk.f32.mxu1 %vm32_vm0, %v4072_v9 }
 0x92d   :  { %3961 = vpow2.f32 %v2106_v48  ;;  %3887 = vmatprep.subr.bf16.mxu1 %v3886_v36 }
 0x92e   :  { %3963 = vpow2.f32 %v2104_v49 }
 0x92f   :  { %v3958_v50 = vpop.eup %3957 }
 0x930   :  { %v3960_v51 = vpop.eup %3959  ;;  %v1921_v52 = vsel %vm400_vm3, %v3958_v50, 0.0  ;;  %3889 = vmatpush3.bf16.msra.mxu1 %v3886_v36 }
 0x931   :  { %1922 = vadd.xlane.f32.xlu1 %v1921_v52  ;;  %v1918_v53 = vsel %vm400_vm3, %v3960_v51, 0.0 }
 0x932   :  { %1919 = vadd.xlane.f32.xlu0 %v1918_v53 }
 0x933   :  { %3693 = vmatmul.mubr.msk.f32.vlgmr.msra.gmra.mrb[40].mxu1 %vm32_vm0, %v4099_v18 }
 0x934   :  { %3695 = vmatprep.mubr.msk.f32.mxu1 %vm32_vm0, %v4104_v19 }
 0x937   :  { %v3962_v54 = vpop.eup %3961  ;;  %3696 = vmatmul.mubr.msk.f32.gmra.mrb[42].mxu1 %vm32_vm0, %v4113_v21 }
 0x938   :  { %v3964_v55 = vpop.eup %3963  ;;  %v2111_v56 = vsel %vm400_vm3, %v3962_v54, 0.0 }
 0x939   :  { %2112 = vadd.xlane.f32.xlu1 %v2111_v56  ;;  %v2108_v57 = vsel %vm400_vm3, %v3964_v55, 0.0 }
 0x93a   :  { %2109 = vadd.xlane.f32.xlu0 %v2108_v57 }
 0x9be   :  { %v1923_v0 = vpop.xlane.xlu1 %1922 }
 0x9bf   :  { %3965 = vrcp.f32 %v1923_v0  ;;  %v1920_v5 = vpop.xlane.xlu0 %1919 }
 0x9c0   :  { %3967 = vrcp.f32 %v1920_v5 }
 0x9c6   :  { %v2113_v6 = vpop.xlane.xlu1 %2112 }
 0x9c7   :  { %3969 = vrcp.f32 %v2113_v6  ;;  %v2110_v7 = vpop.xlane.xlu0 %2109 }
 0x9c8   :  { %3971 = vrcp.f32 %v2110_v7 }
 0x9c9   :  { %v3966_v8 = vpop.eup %3965 }
 0x9ca   :  { %v3968_v10 = vpop.eup %3967  ;;  %v1927_v12 = vmul.f32 %v3966_v8, %v3958_v50 }
 0x9cb   :  { %v1926_v11 = vmul.f32 %v3968_v10, %v3960_v51 }
 0x9cd   :  { %3631 = vmatprep.mubr.msk.f32.mxu0 %vm400_vm3, %v1926_v11 }
 0x9ce   :  { %3632 = vmatmul.mubr.msk.f32.vlgmr.msra.gmra.mrb[28].mxu0 %vm400_vm3, %v1927_v12 }
 0x9cf   :  { %3865 = vmatpush3.bf16.msra.mxu0 %v3862_v63 }
 0x9d0   :  { %3648 = vmatprep.subr.mxu0 %v3195_v17 }
 0x9d1   :  { %v3970_v13 = vpop.eup %3969 }
 0x9d2   :  { %v3972_v14 = vpop.eup %3971  ;;  %v2117_v16 = vmul.f32 %v3970_v13, %v3962_v54 }
 0x9d3   :  { %v2116_v15 = vmul.f32 %v3972_v14, %v3964_v55 }
 0x9d5   :  { %3645 = vmatprep.mubr.msk.f32.mxu0 %vm400_vm3, %v2116_v15 }
 0x9d6   :  { %3646 = vmatmul.mubr.msk.f32.vlgmr.msra.gmra.mrb[30].mxu0 %vm400_vm3, %v2117_v16 }
 0x9d7   :  { %3649 = vmatpush3.msra.mxu0 %v3195_v17 }
 0x9d8   :  { %3875 = vmatprep.subr.bf16.mxu0 %v3874_v23 }
 0x9fa   :  { %v3666_v44 = vpop.f32.mrb[36].mxu1 }
 0x9fb   :  { %v2373_v45 = vpop.f32.mrb[37].mxu1  ;;  %v2393_v56 = vmul.f32 0.35355338, %v3666_v44 }
 0x9fc   :  { %v2392_v46 = vmul.f32 0.35355338, %v2373_v45 }
 0x9fe   :  { %v3669_v47 = vpop.f32.mrb[38].mxu1 }
 0x9ff   :  { %v2383_v48 = vpop.f32.mrb[39].mxu1  ;;  %v2395_v57 = vmul.f32 0.35355338, %v3669_v47 }
 0xa00   :  { %v2394_v49 = vmul.f32 0.35355338, %v2383_v48 }
 0xa02   :  { %3716 = vmatprep.mubr.msk.f32.mxu1 %vm312_vm1, %v2394_v49 }
 0xaa1   :  { %v3633_v39 = vpop.f32.mrb[28].mxu0 }
 0xaa2   :  { %v2000_v40 = vpop.f32.mrb[29].mxu0 }
 0xaa3   :  { %3650 = vmatprep.mubr.msk.f32.mxu0 %vm312_vm1, %v2000_v40 }
 0xaa4   :  { %3651 = vmatmul.mubr.msk.f32.vlgmr.msra.gmra.mrb[20].mxu0 %vm312_vm1, %v3633_v39 }
 0xaa5   :  { %3877 = vmatpush3.bf16.msra.mxu0 %v3874_v23 }
 0xaa6   :  { %3879 = vmatprep.subr.bf16.mxu0 %v3878_v41 }
 0xaa9   :  { %v3647_v42 = vpop.f32.mrb[30].mxu0  ;;  %3881 = vmatpush3.bf16.msra.mxu0 %v3878_v41  ;;  %v3236_v41 = vld [vmem:[%s4476_s4 + $0x18] sm:$0xff] }
 0xaaa   :  { %v2190_v43 = vpop.f32.mrb[31].mxu0 }
 0xaab   :  { %3653 = vmatprep.mubr.msk.f32.mxu0 %vm312_vm1, %v2190_v43 }
 0xaac   :  { %3654 = vmatmul.mubr.msk.f32.gmra.mrb[22].mxu0 %vm312_vm1, %v3647_v42 }
 0xaad   :  { %3678 = vmatprep.mubr.msk.f32.mxu0 %vm32_vm0, %v4072_v9  ;;  %v3694_v9 = vpop.f32.mrb[40].mxu1 }
 0xaae   :  { %v2557_v50 = vpop.f32.mrb[41].mxu1 }
 0xaaf   :  { %v3896_v51 = vpack.c.bf16 %v3694_v9, %v2557_v50  ;;  %v3241_v9 = vld [vmem:[%s4477_s5] ss:$0 sm:$0xff]  ;;  %s3989_s5 = scalar_lea.vmem %s3080_s8, 512 }
 0xab0   :  { %3679 = vmatmul.mubr.msk.f32.vlgmr.msra.gmra.mrb[32].mxu0 %vm32_vm0, %v4099_v18  ;;  %v3697_v18 = vpop.f32.mrb[42].mxu1  ;;  %p3990_p0 = scmp.ne.s32.totalorder %s3080_s8, %s3989_s5  ;;  %p3995_p2 = scmp.lt.s32.totalorder %s3989_s5, %s3989_s5 }
 0xab1   :  { %3681 = vmatprep.mubr.msk.f32.mxu0 %vm32_vm0, %v4104_v19  ;;  %v2567_v58 = vpop.f32.mrb[43].mxu1 }
 0xab2   :  { %v3906_v59 = vpack.c.bf16 %v3697_v18, %v2567_v58  ;;  %p3996_p3 = por %p3995_p2, %p3994_p1 }
 0xab4   :  { %3682 = vmatmul.mubr.msk.f32.gmra.mrb[34].mxu0 %vm32_vm0, %v4113_v21  ;;  %p3997_p4 = pnand %p3996_p3, %p3990_p0 }
 0xab5   :  { %3702 = vmatprep.mubr.msk.f32.mxu0 %vm312_vm1, %v2392_v46 }
 0xb83   :  { %v3680_v52 = vpop.f32.mrb[32].mxu0 }
 0xb84   :  { %v2467_v53 = vpop.f32.mrb[33].mxu0 }
 0xb85   :  { %v3890_v19 = vpack.c.bf16 %v3680_v52, %v2467_v53 }
 0xb87   :  { %v3683_v54 = vpop.f32.mrb[34].mxu0  ;;  %3892 = vmatprep.subr.msk.bf16.mxu0 %vm4133_vm2, %v3890_v19 }
 0xb88   :  { %v2477_v21 = vpop.f32.mrb[35].mxu0  ;;  %3895 = vmatpush3.bf16.xpose.msk.msra.mxu0 %vm4133_vm2, %v3890_v19 }
 0xb89   :  { %v3900_v55 = vpack.c.bf16 %v3683_v54, %v2477_v21  ;;  %3897 = vmatprep.subr.bf16.mxu0 %v3896_v51 }
 0xb8b   :  { %3902 = vmatprep.subr.msk.bf16.mxu1 %vm4133_vm2, %v3900_v55 }
 0xb8c   :  { %3905 = vmatpush3.bf16.xpose.msk.msra.mxu1 %vm4133_vm2, %v3900_v55 }
 0xb8f   :  { %3703 = vmatmul.mubr.msk.f32.vlgmr.msra.gmra.mrb[36].mxu0 %vm312_vm1, %v2393_v56 }
 0xb90   :  { %3899 = vmatpush3.bf16.msra.mxu0 %v3896_v51 }
 0xb91   :  { %3907 = vmatprep.subr.bf16.mxu0 %v3906_v59 }
 0xb93   :  { %3717 = vmatmul.mubr.msk.f32.vlgmr.msra.gmra.mrb[44].mxu1 %vm312_vm1, %v2395_v57 }
 0xc62   :  { %v3704_v60 = vpop.f32.mrb[36].mxu0 }
 0xc63   :  { %v2654_v61 = vpop.f32.mrb[37].mxu0  ;;  %v2666_v62 = vsel %vm400_vm3, %v3704_v60, -inf }
 0xc64   :  { %2667 = vmax.xlane.f32.xlu1 %v2666_v62  ;;  %v2663_v63 = vsel %vm400_vm3, %v2654_v61, -inf }
 0xc65   :  { %2664 = vmax.xlane.f32.xlu0 %v2663_v63 }
 0xc66   :  { %v3718_v24 = vpop.f32.mrb[44].mxu1 }
 0xc67   :  { %v2844_v0 = vpop.f32.mrb[45].mxu1  ;;  %v2856_v5 = vsel %vm400_vm3, %v3718_v24, -inf }
 0xc68   :  { %2857 = vmax.xlane.f32.xlu1 %v2856_v5  ;;  %v2853_v6 = vsel %vm400_vm3, %v2844_v0, -inf }
 0xc69   :  { %2854 = vmax.xlane.f32.xlu0 %v2853_v6 }
 0xcf1   :  { %v2668_v7 = vpop.xlane.xlu1 %2667 }
 0xcf2   :  { %v2670_v8 = vsub.f32 %v3704_v60, %v2668_v7  ;;  %v2665_v10 = vpop.xlane.xlu0 %2664 }
 0xcf3   :  { %v2669_v11 = vsub.f32 %v2654_v61, %v2665_v10 }
 0xcf4   :  { %v2673_v12 = vmul.f32 1.442695, %v2670_v8 }
 0xcf5   :  { %v2671_v13 = vmul.f32 1.442695, %v2669_v11  ;;  %v2858_v14 = vpop.xlane.xlu1 %2857 }
 0xcf6   :  { %3973 = vpow2.f32 %v2673_v12  ;;  %v2860_v15 = vsub.f32 %v3718_v24, %v2858_v14  ;;  %v2855_v16 = vpop.xlane.xlu0 %2854 }
 0xcf7   :  { %3975 = vpow2.f32 %v2671_v13  ;;  %v2859_v17 = vsub.f32 %v2844_v0, %v2855_v16 }
 0xcf8   :  { %v2863_v20 = vmul.f32 1.442695, %v2860_v15 }
 0xcf9   :  { %v2861_v22 = vmul.f32 1.442695, %v2859_v17 }
 0xcfa   :  { %3977 = vpow2.f32 %v2863_v20 }
 0xcfb   :  { %3979 = vpow2.f32 %v2861_v22 }
 0xd00   :  { %v3974_v23 = vpop.eup %3973 }
 0xd01   :  { %v3976_v25 = vpop.eup %3975  ;;  %v2678_v26 = vsel %vm400_vm3, %v3974_v23, 0.0 }
 0xd02   :  { %2679 = vadd.xlane.f32.xlu1 %v2678_v26  ;;  %v2675_v27 = vsel %vm400_vm3, %v3976_v25, 0.0 }
 0xd03   :  { %2676 = vadd.xlane.f32.xlu0 %v2675_v27 }
 0xd04   :  { %v3978_v28 = vpop.eup %3977 }
 0xd05   :  { %v3980_v29 = vpop.eup %3979  ;;  %v2868_v30 = vsel %vm400_vm3, %v3978_v28, 0.0 }
 0xd06   :  { %2869 = vadd.xlane.f32.xlu1 %v2868_v30  ;;  %v2865_v31 = vsel %vm400_vm3, %v3980_v29, 0.0 }
 0xd07   :  { %2866 = vadd.xlane.f32.xlu0 %v2865_v31 }
 0xd8f   :  { %v2680_v32 = vpop.xlane.xlu1 %2679 }
 0xd90   :  { %3981 = vrcp.f32 %v2680_v32  ;;  %v2677_v33 = vpop.xlane.xlu0 %2676 }
 0xd91   :  { %3983 = vrcp.f32 %v2677_v33 }
 0xd93   :  { %v2870_v34 = vpop.xlane.xlu1 %2869 }
 0xd94   :  { %3985 = vrcp.f32 %v2870_v34  ;;  %v2867_v35 = vpop.xlane.xlu0 %2866 }
 0xd95   :  { %3987 = vrcp.f32 %v2867_v35 }
 0xd9a   :  { %v3982_v36 = vpop.eup %3981 }
 0xd9b   :  { %v3984_v37 = vpop.eup %3983  ;;  %v2684_v39 = vmul.f32 %v3982_v36, %v3974_v23 }
 0xd9c   :  { %v2683_v38 = vmul.f32 %v3984_v37, %v3976_v25 }
 0xd9e   :  { %v3986_v40 = vpop.eup %3985  ;;  %3709 = vmatprep.mubr.msk.f32.mxu0 %vm400_vm3, %v2683_v38 }
 0xd9f   :  { %v3988_v42 = vpop.eup %3987  ;;  %3710 = vmatmul.mubr.msk.f32.vlgmr.msra.gmra.mrb[38].mxu0 %vm400_vm3, %v2684_v39  ;;  %v2874_v44 = vmul.f32 %v3986_v40, %v3978_v28 }
 0xda0   :  { %3909 = vmatpush3.bf16.msra.mxu0 %v3906_v59  ;;  %v2873_v43 = vmul.f32 %v3988_v42, %v3980_v29 }
 0xda1   :  { %3726 = vmatprep.subr.mxu0 %v3236_v41 }
 0xda2   :  { %3723 = vmatprep.mubr.msk.f32.mxu0 %vm400_vm3, %v2873_v43 }
 0xda3   :  { %3724 = vmatmul.mubr.msk.f32.vlgmr.msra.gmra.mrb[40].mxu0 %vm400_vm3, %v2874_v44 }
 0xda4   :  { %3727 = vmatpush3.msra.mxu0 %v3236_v41 }
 0xe72   :  { %v3711_v45 = vpop.f32.mrb[38].mxu0 }
 0xe73   :  { %v2757_v46 = vpop.f32.mrb[39].mxu0 }
 0xe74   :  { %3728 = vmatprep.mubr.msk.f32.mxu0 %vm312_vm1, %v2757_v46 }
 0xe75   :  { %3729 = vmatmul.mubr.msk.f32.vlgmr.msra.gmra.mrb[20].mxu0 %vm312_vm1, %v3711_v45 }
 0xe76   :  { %v3725_v47 = vpop.f32.mrb[40].mxu0 }
 0xe77   :  { %v2947_v48 = vpop.f32.mrb[41].mxu0 }
 0xe78   :  { %3731 = vmatprep.mubr.msk.f32.mxu0 %vm312_vm1, %v2947_v48 }
 0xe79   :  { %3732 = vmatmul.mubr.msk.f32.gmra.mrb[22].mxu0 %vm312_vm1, %v3725_v47 }
 0xf48   :  { %v3730_v49 = vpop.f32.mrb[20].mxu0 }
 0xf49   :  { %v3910_v50 = vadd.f32 %v3730_v49, %v4305_v1  ;;  %v3036_v51 = vpop.f32.mrb[21].mxu0 }
 0xf4a   :  { %v3911_v18 = vadd.f32 %v3036_v51, %v4307_v2 }
 0xf4b   :  { %v3067_v52 = vadd.f32 %v3910_v50, %v3241_v9 }
 0xf4c   :  { %v3066_v53 = vadd.f32 %v3911_v18, %v3241_v9  ;;  %v3733_v19 = vpop.f32.mrb[22].mxu0 }
 0xf4d   :  { %3071 = vst [vmem:[#allocation2 + $0x8] sm:$0xff] %v3067_v52  ;;  %v3912_v54 = vadd.f32 %v3733_v19, %v4309_v3  ;;  %v3046_v21 = vpop.f32.mrb[23].mxu0 }
 0xf4e   :  { %3070 = vst [vmem:[#allocation2] sm:$0xff] %v3066_v53  ;;  %v3913_v55 = vadd.f32 %v3046_v21, %v4311_v4 }
 0xf4f   :  { %v3069_v56 = vadd.f32 %v3912_v54, %v3241_v9 }
 0xf50   :  { %v3068_v57 = vadd.f32 %v3913_v55, %v3241_v9 }
 0xf51   :  { %3073 = vst [vmem:[#allocation2 + $0x18] sm:$0xff] %v3069_v56 }
 0xf52   :  { %3072 = vst [vmem:[#allocation2 + $0x10] sm:$0xff] %v3068_v57 }
 0xf53   :  { %4000 = shalt.err (!%p3997_p4)
}
 0xf54   :  { %s4001_s11 = scalar_lea.hbm %s4478_s6, 512 }
 0xf55   :  { %p4002_p5 = scmp.ne.s32.totalorder %s4478_s6, %s4001_s11  ;;  %p4005_p6 = scmp.lt.u32.totalorder %s4001_s11, %s4478_s6 }
 0xf57   :  { %p4007_p7 = pnand %p4005_p6, %p4002_p5 }
 0xf59   :  { %4010 = shalt.err (!%p4007_p7)
}
 0xf5a   :  { %s4014_s16 = smov 128   ;;  %s4015_s17 = smov 8  }
 0xf5b   :  { %3085 = dma.vmem_to_hbm [thread:$0]  %s3080_s8, 512, %s4478_s6, [#allocation3], %s4014_s16, %s4014_s16, %s4015_s17  }
 0xf5c   :  { %4011 = dma.done.wait [#allocation3], 512  }
 0xf5d   :  { %4012 = vsyncadd [#allocation3], 4294966784 }
 0xf5e   :  { %3089 = vsyncpa [#allocation3], 1 }

</bundles_post_ra>
